<compile_context>
chip_gen: v5e
topology: v5e:2x2
jax: 0.10.0
libtpu: 0.0.40
codegen_flags: <defaults>
</compile_context>

<pallas_src>
import functools

import jax
import jax.numpy as jnp
import numpy as np
from jax import lax
from jax.experimental import pallas as pl
from jax.experimental.pallas import tpu as pltpu

EPS = 1e-5
KS = 5          # depthwise kernel size
PAD = 2         # depthwise padding
CT = 128        # output-channel tile (lane width)


def _fused_kernel(x_ref, w1_ref, g_ref, b_ref, w2_ref, o_ref, *, N, H, W, HP, WP, n_valid):
    # x_ref : [N*HP*WP, C_in]  bf16; zero everywhere except the N*H*W valid pixels
    # w1_ref: [C_in, CT]       bf16   (1x1 conv weight tile)
    # g_ref, b_ref: [1, CT]    f32    (BN affine tile)
    # w2_ref: [KS*KS, CT]      f32    (depthwise taps tile, row = kh*KS + kw)
    # o_ref : [N, H, 8, CT]    f32    (columns >= W are junk, cropped by the caller)
    rows = N * HP * WP

    # --- 1x1 conv: MXU matmul, bf16 operands, f32 accumulation ------------------
    y = jnp.dot(x_ref[...], w1_ref[...], preferred_element_type=jnp.float32)   # [rows, CT]

    # --- BatchNorm (training-mode batch statistics), single pass ----------------
    # Padding rows of x are exactly zero, so they contribute nothing to the sums.
    s = jnp.sum(y, axis=0, keepdims=True)
    ss = jnp.sum(y * y, axis=0, keepdims=True)
    mean = s * (1.0 / n_valid)
    var = ss * (1.0 / n_valid) - mean * mean
    scale = lax.rsqrt(var + EPS) * g_ref[...]            # single EUP rsqrt
    shift = b_ref[...] - mean * scale
    act = jnp.maximum(y * scale + shift, 0.0)            # [rows, CT]

    # --- re-zero padding positions (BN shift/ReLU made them nonzero) ------------
    a4 = act.reshape(N, HP, WP, CT)                      # layout-preserving (WP = 16)
    hi = lax.broadcasted_iota(jnp.int32, (N, HP, WP, CT), 1)
    wi = lax.broadcasted_iota(jnp.int32, (N, HP, WP, CT), 2)
    valid = (hi >= PAD) & (hi < PAD + H) & (wi >= PAD) & (wi < PAD + W)
    a4 = jnp.where(valid, a4, 0.0)
    aflat = a4.reshape(rows, CT)

    # --- depthwise 5x5 conv ------------------------------------------------------
    # 5 sublane-shifted copies (one per kw, zero-filled) instead of 25 misaligned
    # window slices; the kh taps slice a leading (non-tiled) axis, which is free.
    abig = jnp.concatenate([aflat, jnp.zeros((8, CT), jnp.float32)], axis=0)
    w2 = w2_ref[...]                                     # [25, CT]
    acc = jnp.zeros((N, H, 8, CT), jnp.float32)
    for kw in range(KS):
        shifted = abig[kw:kw + rows, :]                  # shift left by kw (zero fill)
        r = shifted.reshape(N, HP, WP, CT)[:, :, 0:8, :]  # [N, HP, 8, CT] (aligned slice)
        for kh in range(KS):
            t = kh * KS + kw
            tap = w2[t:t + 1, :].reshape(1, 1, 1, CT)
            acc = acc + r[:, kh:kh + H, :, :] * tap
    o_ref[...] = acc


def forward(x_nchw, w1, gamma, beta, w2):
    """x_nchw: [N, C_in, H, W]; w1: [C_mid, C_in, 1, 1]; w2: [C_mid, 1, 5, 5]."""
    N, C_in, H, W = x_nchw.shape
    C_mid = w1.shape[0]
    assert C_mid % CT == 0
    HP = H + 2 * PAD
    WP = 16                                              # 2 sublane groups >= W + 2*PAD
    assert W + 2 * PAD <= WP and W <= 8 and H >= KS - 2 * PAD

    # Channel-last + zero-placement into the padded canvas (tiny input-side glue).
    x_nhwc = jnp.transpose(x_nchw, (0, 2, 3, 1))
    x_can = jnp.zeros((N, HP, WP, C_in), jnp.float32)
    x_can = x_can.at[:, PAD:PAD + H, PAD:PAD + W, :].set(x_nhwc)
    x_arr = x_can.reshape(N * HP * WP, C_in).astype(jnp.bfloat16)

    w1_mat = jnp.transpose(w1.reshape(C_mid, C_in), (1, 0)).astype(jnp.bfloat16)  # [C_in, C_mid]
    w2_mat = jnp.transpose(w2.reshape(C_mid, KS * KS), (1, 0))                    # [25, C_mid]
    g = gamma.reshape(1, C_mid).astype(jnp.float32)
    b = beta.reshape(1, C_mid).astype(jnp.float32)

    rows = N * HP * WP
    kernel = functools.partial(_fused_kernel, N=N, H=H, W=W, HP=HP, WP=WP,
                               n_valid=N * H * W)

    out_p = pl.pallas_call(
        kernel,
        out_shape=jax.ShapeDtypeStruct((N, H, 8, C_mid), jnp.float32),
        grid=(C_mid // CT,),
        in_specs=[
            pl.BlockSpec((rows, C_in), lambda c: (0, 0)),    # x: same block every step
            pl.BlockSpec((C_in, CT), lambda c: (0, c)),      # w1 tile (pipelined DMA)
            pl.BlockSpec((1, CT), lambda c: (0, c)),         # gamma tile
            pl.BlockSpec((1, CT), lambda c: (0, c)),         # beta tile
            pl.BlockSpec((KS * KS, CT), lambda c: (0, c)),   # depthwise taps tile
        ],
        out_specs=pl.BlockSpec((N, H, 8, CT), lambda c: (0, 0, 0, c)),
        compiler_params=pltpu.CompilerParams(dimension_semantics=("parallel",)),
    )(x_arr, w1_mat, g, b, w2_mat)

    out = out_p[:, :, :W, :]                               # drop the junk column(s)
    return jnp.transpose(out, (0, 3, 1, 2))                # back to NCHW


def reference(x_nchw, w1, gamma, beta, w2):
    """Pure-JAX f32 reference mirroring the PyTorch forward (training-mode BN)."""
    C_mid = w1.shape[0]
    y = jnp.einsum('nchw,oc->nohw', x_nchw, w1.reshape(C_mid, -1))
    mean = jnp.mean(y, axis=(0, 2, 3), keepdims=True)
    var = jnp.mean((y - mean) ** 2, axis=(0, 2, 3), keepdims=True)
    y = (y - mean) / jnp.sqrt(var + EPS)
    y = y * gamma[None, :, None, None] + beta[None, :, None, None]
    y = jnp.maximum(y, 0.0)
    yp = jnp.pad(y, ((0, 0), (0, 0), (PAD, PAD), (PAD, PAD)))
    H, W = x_nchw.shape[2], x_nchw.shape[3]
    out = jnp.zeros_like(y)
    for kh in range(KS):
        for kw in range(KS):
            out = out + yp[:, :, kh:kh + H, kw:kw + W] * w2[:, 0, kh, kw][None, :, None, None]
    return out


if __name__ == "__main__":
    key = jax.random.PRNGKey(0)
    kx, kw1, kw2, kg, kb = jax.random.split(key, 5)

    # Shapes fixed by the module: x [1,192,7,7], 1x1 conv 192->1152, depthwise 5x5.
    x = jax.random.normal(kx, (1, 192, 7, 7), dtype=jnp.float32)
    w1 = jax.random.normal(kw1, (1152, 192, 1, 1), dtype=jnp.float32) * 0.05
    w2 = jax.random.normal(kw2, (1152, 1, 5, 5), dtype=jnp.float32) * 0.05
    gamma = 1.0 + 0.1 * jax.random.normal(kg, (1152,), dtype=jnp.float32)
    beta = 0.1 * jax.random.normal(kb, (1152,), dtype=jnp.float32)
    # TODO(synk): running_mean/var tracking (training-mode BN side effect) is not
    # reproduced; it does not affect the forward output.

    out = jax.block_until_ready(jax.jit(forward)(x, w1, gamma, beta, w2))
    ref = jax.block_until_ready(reference(x, w1, gamma, beta, w2))

    assert out.shape == (1, 1152, 7, 7), out.shape
    # bf16 MXU operands (f32 accumulation) => slightly looser tolerance than pure f32.
    np.testing.assert_allclose(np.asarray(out), np.asarray(ref), atol=1e-2, rtol=1e-2)
    print("KERNEL_OK")
</pallas_src>

<mosaic_0001>
module attributes {stable_mosaic.version = 11 : i64} {
  func.func @_fused_kernel(%arg0: i32, %arg1: memref<176x192xbf16, #tpu.memory_space<vmem>>, %arg2: memref<192x128xbf16, #tpu.memory_space<vmem>>, %arg3: memref<1x128xf32, #tpu.memory_space<vmem>>, %arg4: memref<1x128xf32, #tpu.memory_space<vmem>>, %arg5: memref<25x128xf32, #tpu.memory_space<vmem>>, %arg6: memref<1x7x8x128xf32, #tpu.memory_space<vmem>>) attributes {dimension_semantics = [#tpu.dimension_semantics<parallel>], iteration_bounds = array<i64: 9>, scalar_prefetch = 0 : i64, scratch_operands = 0 : i64, tpu.core_type = #tpu.core_type<tc>, window_params = [{pipeline_mode = #tpu.pipeline_mode<synchronous>, transform_indices = @transform_0, window_bounds = array<i64: 176, 192>}, {transform_indices = @transform_1, window_bounds = array<i64: 192, 128>}, {transform_indices = @transform_2, window_bounds = array<i64: 1, 128>}, {transform_indices = @transform_3, window_bounds = array<i64: 1, 128>}, {transform_indices = @transform_4, window_bounds = array<i64: 25, 128>}, {transform_indices = @transform_5, window_bounds = array<i64: 1, 7, 8, 128>}]} {
    %c0 = arith.constant 0 : index
    %c0_0 = arith.constant 0 : index
    %0 = vector.load %arg1[%c0, %c0_0] : memref<176x192xbf16, #tpu.memory_space<vmem>>, vector<176x192xbf16>
    %c0_1 = arith.constant 0 : index
    %c0_2 = arith.constant 0 : index
    %1 = vector.load %arg2[%c0_1, %c0_2] : memref<192x128xbf16, #tpu.memory_space<vmem>>, vector<192x128xbf16>
    %cst = arith.constant dense<0.000000e+00> : vector<176x128xf32>
    %2 = tpu.matmul %0, %1, %cst {dimension_numbers = #tpu.dot_dimension_numbers<[1], [0], [0], [1], [0, 0, 1, 1], [], []>} : vector<176x192xbf16>, vector<192x128xbf16>, vector<176x128xf32> -> vector<176x128xf32>
    %cst_3 = arith.constant dense<0.000000e+00> : vector<128xf32>
    %3 = vector.multi_reduction <add>, %2, %cst_3 [0] : vector<176x128xf32> to vector<128xf32>
    %4 = vector.shape_cast %3 : vector<128xf32> to vector<1x128xf32>
    %5 = arith.mulf %2, %2 : vector<176x128xf32>
    %cst_4 = arith.constant dense<0.000000e+00> : vector<128xf32>
    %6 = vector.multi_reduction <add>, %5, %cst_4 [0] : vector<176x128xf32> to vector<128xf32>
    %7 = vector.shape_cast %6 : vector<128xf32> to vector<1x128xf32>
    %cst_5 = arith.constant 0.0204081628 : f32
    %8 = vector.broadcast %cst_5 : f32 to vector<1x128xf32>
    %9 = arith.mulf %4, %8 : vector<1x128xf32>
    %cst_6 = arith.constant 0.0204081628 : f32
    %10 = vector.broadcast %cst_6 : f32 to vector<1x128xf32>
    %11 = arith.mulf %7, %10 : vector<1x128xf32>
    %12 = arith.mulf %9, %9 : vector<1x128xf32>
    %13 = arith.subf %11, %12 : vector<1x128xf32>
    %cst_7 = arith.constant 9.99999974E-6 : f32
    %14 = vector.broadcast %cst_7 : f32 to vector<1x128xf32>
    %15 = arith.addf %13, %14 : vector<1x128xf32>
    %16 = math.rsqrt %15 : vector<1x128xf32>
    %c0_8 = arith.constant 0 : index
    %c0_9 = arith.constant 0 : index
    %17 = vector.load %arg3[%c0_8, %c0_9] : memref<1x128xf32, #tpu.memory_space<vmem>>, vector<1x128xf32>
    %18 = arith.mulf %16, %17 : vector<1x128xf32>
    %c0_10 = arith.constant 0 : index
    %c0_11 = arith.constant 0 : index
    %19 = vector.load %arg4[%c0_10, %c0_11] : memref<1x128xf32, #tpu.memory_space<vmem>>, vector<1x128xf32>
    %20 = arith.mulf %9, %18 : vector<1x128xf32>
    %21 = arith.subf %19, %20 : vector<1x128xf32>
    %22 = vector.broadcast %18 : vector<1x128xf32> to vector<176x128xf32>
    %23 = arith.mulf %2, %22 : vector<176x128xf32>
    %24 = vector.broadcast %21 : vector<1x128xf32> to vector<176x128xf32>
    %25 = arith.addf %23, %24 : vector<176x128xf32>
    %cst_12 = arith.constant 0.000000e+00 : f32
    %26 = vector.broadcast %cst_12 : f32 to vector<176x128xf32>
    %27 = arith.maximumf %25, %26 : vector<176x128xf32>
    %28 = vector.shape_cast %27 : vector<176x128xf32> to vector<1x11x16x128xf32>
    %29 = tpu.iota {dimensions = array<i32: 1>} : vector<1x11x16x128xi32>
    %30 = tpu.iota {dimensions = array<i32: 2>} : vector<1x11x16x128xi32>
    %c2_i32 = arith.constant 2 : i32
    %31 = vector.broadcast %c2_i32 : i32 to vector<1x11x16x128xi32>
    %32 = arith.cmpi sge, %29, %31 : vector<1x11x16x128xi32>
    %c9_i32 = arith.constant 9 : i32
    %33 = vector.broadcast %c9_i32 : i32 to vector<1x11x16x128xi32>
    %34 = arith.cmpi slt, %29, %33 : vector<1x11x16x128xi32>
    %35 = arith.andi %32, %34 : vector<1x11x16x128xi1>
    %c2_i32_13 = arith.constant 2 : i32
    %36 = vector.broadcast %c2_i32_13 : i32 to vector<1x11x16x128xi32>
    %37 = arith.cmpi sge, %30, %36 : vector<1x11x16x128xi32>
    %38 = arith.andi %35, %37 : vector<1x11x16x128xi1>
    %c9_i32_14 = arith.constant 9 : i32
    %39 = vector.broadcast %c9_i32_14 : i32 to vector<1x11x16x128xi32>
    %40 = arith.cmpi slt, %30, %39 : vector<1x11x16x128xi32>
    %41 = arith.andi %38, %40 : vector<1x11x16x128xi1>
    %cst_15 = arith.constant 0.000000e+00 : f32
    %42 = vector.broadcast %cst_15 : f32 to vector<1x11x16x128xf32>
    %43 = arith.select %41, %28, %42 : vector<1x11x16x128xi1>, vector<1x11x16x128xf32>
    %44 = vector.shape_cast %43 : vector<1x11x16x128xf32> to vector<176x128xf32>
    %cst_16 = arith.constant 0.000000e+00 : f32
    %45 = vector.broadcast %cst_16 : f32 to vector<8x128xf32>
    %46 = tpu.concatenate %44, %45 in 0 : vector<176x128xf32>, vector<8x128xf32> -> vector<184x128xf32>
    %c0_17 = arith.constant 0 : index
    %c0_18 = arith.constant 0 : index
    %47 = vector.load %arg5[%c0_17, %c0_18] : memref<25x128xf32, #tpu.memory_space<vmem>>, vector<25x128xf32>
    %cst_19 = arith.constant 0.000000e+00 : f32
    %48 = vector.broadcast %cst_19 : f32 to vector<1x7x8x128xf32>
    %49 = vector.extract_strided_slice %46 {offsets = [0, 0], sizes = [176, 128], strides = [1, 1]} : vector<184x128xf32> to vector<176x128xf32>
    %50 = vector.shape_cast %49 : vector<176x128xf32> to vector<1x11x16x128xf32>
    %51 = vector.extract_strided_slice %50 {offsets = [0, 0, 0, 0], sizes = [1, 11, 8, 128], strides = [1, 1, 1, 1]} : vector<1x11x16x128xf32> to vector<1x11x8x128xf32>
    %52 = vector.extract_strided_slice %47 {offsets = [0, 0], sizes = [1, 128], strides = [1, 1]} : vector<25x128xf32> to vector<1x128xf32>
    %53 = vector.shape_cast %52 : vector<1x128xf32> to vector<1x1x1x128xf32>
    %54 = vector.extract_strided_slice %51 {offsets = [0, 0, 0, 0], sizes = [1, 7, 8, 128], strides = [1, 1, 1, 1]} : vector<1x11x8x128xf32> to vector<1x7x8x128xf32>
    %55 = vector.broadcast %53 : vector<1x1x1x128xf32> to vector<1x7x8x128xf32>
    %56 = arith.mulf %54, %55 : vector<1x7x8x128xf32>
    %57 = arith.addf %48, %56 : vector<1x7x8x128xf32>
    %58 = vector.extract_strided_slice %47 {offsets = [5, 0], sizes = [1, 128], strides = [1, 1]} : vector<25x128xf32> to vector<1x128xf32>
    %59 = vector.shape_cast %58 : vector<1x128xf32> to vector<1x1x1x128xf32>
    %60 = vector.extract_strided_slice %51 {offsets = [0, 1, 0, 0], sizes = [1, 7, 8, 128], strides = [1, 1, 1, 1]} : vector<1x11x8x128xf32> to vector<1x7x8x128xf32>
    %61 = vector.broadcast %59 : vector<1x1x1x128xf32> to vector<1x7x8x128xf32>
    %62 = arith.mulf %60, %61 : vector<1x7x8x128xf32>
    %63 = arith.addf %57, %62 : vector<1x7x8x128xf32>
    %64 = vector.extract_strided_slice %47 {offsets = [10, 0], sizes = [1, 128], strides = [1, 1]} : vector<25x128xf32> to vector<1x128xf32>
    %65 = vector.shape_cast %64 : vector<1x128xf32> to vector<1x1x1x128xf32>
    %66 = vector.extract_strided_slice %51 {offsets = [0, 2, 0, 0], sizes = [1, 7, 8, 128], strides = [1, 1, 1, 1]} : vector<1x11x8x128xf32> to vector<1x7x8x128xf32>
    %67 = vector.broadcast %65 : vector<1x1x1x128xf32> to vector<1x7x8x128xf32>
    %68 = arith.mulf %66, %67 : vector<1x7x8x128xf32>
    %69 = arith.addf %63, %68 : vector<1x7x8x128xf32>
    %70 = vector.extract_strided_slice %47 {offsets = [15, 0], sizes = [1, 128], strides = [1, 1]} : vector<25x128xf32> to vector<1x128xf32>
    %71 = vector.shape_cast %70 : vector<1x128xf32> to vector<1x1x1x128xf32>
    %72 = vector.extract_strided_slice %51 {offsets = [0, 3, 0, 0], sizes = [1, 7, 8, 128], strides = [1, 1, 1, 1]} : vector<1x11x8x128xf32> to vector<1x7x8x128xf32>
    %73 = vector.broadcast %71 : vector<1x1x1x128xf32> to vector<1x7x8x128xf32>
    %74 = arith.mulf %72, %73 : vector<1x7x8x128xf32>
    %75 = arith.addf %69, %74 : vector<1x7x8x128xf32>
    %76 = vector.extract_strided_slice %47 {offsets = [20, 0], sizes = [1, 128], strides = [1, 1]} : vector<25x128xf32> to vector<1x128xf32>
    %77 = vector.shape_cast %76 : vector<1x128xf32> to vector<1x1x1x128xf32>
    %78 = vector.extract_strided_slice %51 {offsets = [0, 4, 0, 0], sizes = [1, 7, 8, 128], strides = [1, 1, 1, 1]} : vector<1x11x8x128xf32> to vector<1x7x8x128xf32>
    %79 = vector.broadcast %77 : vector<1x1x1x128xf32> to vector<1x7x8x128xf32>
    %80 = arith.mulf %78, %79 : vector<1x7x8x128xf32>
    %81 = arith.addf %75, %80 : vector<1x7x8x128xf32>
    %82 = vector.extract_strided_slice %46 {offsets = [1, 0], sizes = [176, 128], strides = [1, 1]} : vector<184x128xf32> to vector<176x128xf32>
    %83 = vector.shape_cast %82 : vector<176x128xf32> to vector<1x11x16x128xf32>
    %84 = vector.extract_strided_slice %83 {offsets = [0, 0, 0, 0], sizes = [1, 11, 8, 128], strides = [1, 1, 1, 1]} : vector<1x11x16x128xf32> to vector<1x11x8x128xf32>
    %85 = vector.extract_strided_slice %47 {offsets = [1, 0], sizes = [1, 128], strides = [1, 1]} : vector<25x128xf32> to vector<1x128xf32>
    %86 = vector.shape_cast %85 : vector<1x128xf32> to vector<1x1x1x128xf32>
    %87 = vector.extract_strided_slice %84 {offsets = [0, 0, 0, 0], sizes = [1, 7, 8, 128], strides = [1, 1, 1, 1]} : vector<1x11x8x128xf32> to vector<1x7x8x128xf32>
    %88 = vector.broadcast %86 : vector<1x1x1x128xf32> to vector<1x7x8x128xf32>
    %89 = arith.mulf %87, %88 : vector<1x7x8x128xf32>
    %90 = arith.addf %81, %89 : vector<1x7x8x128xf32>
    %91 = vector.extract_strided_slice %47 {offsets = [6, 0], sizes = [1, 128], strides = [1, 1]} : vector<25x128xf32> to vector<1x128xf32>
    %92 = vector.shape_cast %91 : vector<1x128xf32> to vector<1x1x1x128xf32>
    %93 = vector.extract_strided_slice %84 {offsets = [0, 1, 0, 0], sizes = [1, 7, 8, 128], strides = [1, 1, 1, 1]} : vector<1x11x8x128xf32> to vector<1x7x8x128xf32>
    %94 = vector.broadcast %92 : vector<1x1x1x128xf32> to vector<1x7x8x128xf32>
    %95 = arith.mulf %93, %94 : vector<1x7x8x128xf32>
    %96 = arith.addf %90, %95 : vector<1x7x8x128xf32>
    %97 = vector.extract_strided_slice %47 {offsets = [11, 0], sizes = [1, 128], strides = [1, 1]} : vector<25x128xf32> to vector<1x128xf32>
    %98 = vector.shape_cast %97 : vector<1x128xf32> to vector<1x1x1x128xf32>
    %99 = vector.extract_strided_slice %84 {offsets = [0, 2, 0, 0], sizes = [1, 7, 8, 128], strides = [1, 1, 1, 1]} : vector<1x11x8x128xf32> to vector<1x7x8x128xf32>
    %100 = vector.broadcast %98 : vector<1x1x1x128xf32> to vector<1x7x8x128xf32>
    %101 = arith.mulf %99, %100 : vector<1x7x8x128xf32>
    %102 = arith.addf %96, %101 : vector<1x7x8x128xf32>
    %103 = vector.extract_strided_slice %47 {offsets = [16, 0], sizes = [1, 128], strides = [1, 1]} : vector<25x128xf32> to vector<1x128xf32>
    %104 = vector.shape_cast %103 : vector<1x128xf32> to vector<1x1x1x128xf32>
    %105 = vector.extract_strided_slice %84 {offsets = [0, 3, 0, 0], sizes = [1, 7, 8, 128], strides = [1, 1, 1, 1]} : vector<1x11x8x128xf32> to vector<1x7x8x128xf32>
    %106 = vector.broadcast %104 : vector<1x1x1x128xf32> to vector<1x7x8x128xf32>
    %107 = arith.mulf %105, %106 : vector<1x7x8x128xf32>
    %108 = arith.addf %102, %107 : vector<1x7x8x128xf32>
    %109 = vector.extract_strided_slice %47 {offsets = [21, 0], sizes = [1, 128], strides = [1, 1]} : vector<25x128xf32> to vector<1x128xf32>
    %110 = vector.shape_cast %109 : vector<1x128xf32> to vector<1x1x1x128xf32>
    %111 = vector.extract_strided_slice %84 {offsets = [0, 4, 0, 0], sizes = [1, 7, 8, 128], strides = [1, 1, 1, 1]} : vector<1x11x8x128xf32> to vector<1x7x8x128xf32>
    %112 = vector.broadcast %110 : vector<1x1x1x128xf32> to vector<1x7x8x128xf32>
    %113 = arith.mulf %111, %112 : vector<1x7x8x128xf32>
    %114 = arith.addf %108, %113 : vector<1x7x8x128xf32>
    %115 = vector.extract_strided_slice %46 {offsets = [2, 0], sizes = [176, 128], strides = [1, 1]} : vector<184x128xf32> to vector<176x128xf32>
    %116 = vector.shape_cast %115 : vector<176x128xf32> to vector<1x11x16x128xf32>
    %117 = vector.extract_strided_slice %116 {offsets = [0, 0, 0, 0], sizes = [1, 11, 8, 128], strides = [1, 1, 1, 1]} : vector<1x11x16x128xf32> to vector<1x11x8x128xf32>
    %118 = vector.extract_strided_slice %47 {offsets = [2, 0], sizes = [1, 128], strides = [1, 1]} : vector<25x128xf32> to vector<1x128xf32>
    %119 = vector.shape_cast %118 : vector<1x128xf32> to vector<1x1x1x128xf32>
    %120 = vector.extract_strided_slice %117 {offsets = [0, 0, 0, 0], sizes = [1, 7, 8, 128], strides = [1, 1, 1, 1]} : vector<1x11x8x128xf32> to vector<1x7x8x128xf32>
    %121 = vector.broadcast %119 : vector<1x1x1x128xf32> to vector<1x7x8x128xf32>
    %122 = arith.mulf %120, %121 : vector<1x7x8x128xf32>
    %123 = arith.addf %114, %122 : vector<1x7x8x128xf32>
    %124 = vector.extract_strided_slice %47 {offsets = [7, 0], sizes = [1, 128], strides = [1, 1]} : vector<25x128xf32> to vector<1x128xf32>
    %125 = vector.shape_cast %124 : vector<1x128xf32> to vector<1x1x1x128xf32>
    %126 = vector.extract_strided_slice %117 {offsets = [0, 1, 0, 0], sizes = [1, 7, 8, 128], strides = [1, 1, 1, 1]} : vector<1x11x8x128xf32> to vector<1x7x8x128xf32>
    %127 = vector.broadcast %125 : vector<1x1x1x128xf32> to vector<1x7x8x128xf32>
    %128 = arith.mulf %126, %127 : vector<1x7x8x128xf32>
    %129 = arith.addf %123, %128 : vector<1x7x8x128xf32>
    %130 = vector.extract_strided_slice %47 {offsets = [12, 0], sizes = [1, 128], strides = [1, 1]} : vector<25x128xf32> to vector<1x128xf32>
    %131 = vector.shape_cast %130 : vector<1x128xf32> to vector<1x1x1x128xf32>
    %132 = vector.extract_strided_slice %117 {offsets = [0, 2, 0, 0], sizes = [1, 7, 8, 128], strides = [1, 1, 1, 1]} : vector<1x11x8x128xf32> to vector<1x7x8x128xf32>
    %133 = vector.broadcast %131 : vector<1x1x1x128xf32> to vector<1x7x8x128xf32>
    %134 = arith.mulf %132, %133 : vector<1x7x8x128xf32>
    %135 = arith.addf %129, %134 : vector<1x7x8x128xf32>
    %136 = vector.extract_strided_slice %47 {offsets = [17, 0], sizes = [1, 128], strides = [1, 1]} : vector<25x128xf32> to vector<1x128xf32>
    %137 = vector.shape_cast %136 : vector<1x128xf32> to vector<1x1x1x128xf32>
    %138 = vector.extract_strided_slice %117 {offsets = [0, 3, 0, 0], sizes = [1, 7, 8, 128], strides = [1, 1, 1, 1]} : vector<1x11x8x128xf32> to vector<1x7x8x128xf32>
    %139 = vector.broadcast %137 : vector<1x1x1x128xf32> to vector<1x7x8x128xf32>
    %140 = arith.mulf %138, %139 : vector<1x7x8x128xf32>
    %141 = arith.addf %135, %140 : vector<1x7x8x128xf32>
    %142 = vector.extract_strided_slice %47 {offsets = [22, 0], sizes = [1, 128], strides = [1, 1]} : vector<25x128xf32> to vector<1x128xf32>
    %143 = vector.shape_cast %142 : vector<1x128xf32> to vector<1x1x1x128xf32>
    %144 = vector.extract_strided_slice %117 {offsets = [0, 4, 0, 0], sizes = [1, 7, 8, 128], strides = [1, 1, 1, 1]} : vector<1x11x8x128xf32> to vector<1x7x8x128xf32>
    %145 = vector.broadcast %143 : vector<1x1x1x128xf32> to vector<1x7x8x128xf32>
    %146 = arith.mulf %144, %145 : vector<1x7x8x128xf32>
    %147 = arith.addf %141, %146 : vector<1x7x8x128xf32>
    %148 = vector.extract_strided_slice %46 {offsets = [3, 0], sizes = [176, 128], strides = [1, 1]} : vector<184x128xf32> to vector<176x128xf32>
    %149 = vector.shape_cast %148 : vector<176x128xf32> to vector<1x11x16x128xf32>
    %150 = vector.extract_strided_slice %149 {offsets = [0, 0, 0, 0], sizes = [1, 11, 8, 128], strides = [1, 1, 1, 1]} : vector<1x11x16x128xf32> to vector<1x11x8x128xf32>
    %151 = vector.extract_strided_slice %47 {offsets = [3, 0], sizes = [1, 128], strides = [1, 1]} : vector<25x128xf32> to vector<1x128xf32>
    %152 = vector.shape_cast %151 : vector<1x128xf32> to vector<1x1x1x128xf32>
    %153 = vector.extract_strided_slice %150 {offsets = [0, 0, 0, 0], sizes = [1, 7, 8, 128], strides = [1, 1, 1, 1]} : vector<1x11x8x128xf32> to vector<1x7x8x128xf32>
    %154 = vector.broadcast %152 : vector<1x1x1x128xf32> to vector<1x7x8x128xf32>
    %155 = arith.mulf %153, %154 : vector<1x7x8x128xf32>
    %156 = arith.addf %147, %155 : vector<1x7x8x128xf32>
    %157 = vector.extract_strided_slice %47 {offsets = [8, 0], sizes = [1, 128], strides = [1, 1]} : vector<25x128xf32> to vector<1x128xf32>
    %158 = vector.shape_cast %157 : vector<1x128xf32> to vector<1x1x1x128xf32>
    %159 = vector.extract_strided_slice %150 {offsets = [0, 1, 0, 0], sizes = [1, 7, 8, 128], strides = [1, 1, 1, 1]} : vector<1x11x8x128xf32> to vector<1x7x8x128xf32>
    %160 = vector.broadcast %158 : vector<1x1x1x128xf32> to vector<1x7x8x128xf32>
    %161 = arith.mulf %159, %160 : vector<1x7x8x128xf32>
    %162 = arith.addf %156, %161 : vector<1x7x8x128xf32>
    %163 = vector.extract_strided_slice %47 {offsets = [13, 0], sizes = [1, 128], strides = [1, 1]} : vector<25x128xf32> to vector<1x128xf32>
    %164 = vector.shape_cast %163 : vector<1x128xf32> to vector<1x1x1x128xf32>
    %165 = vector.extract_strided_slice %150 {offsets = [0, 2, 0, 0], sizes = [1, 7, 8, 128], strides = [1, 1, 1, 1]} : vector<1x11x8x128xf32> to vector<1x7x8x128xf32>
    %166 = vector.broadcast %164 : vector<1x1x1x128xf32> to vector<1x7x8x128xf32>
    %167 = arith.mulf %165, %166 : vector<1x7x8x128xf32>
    %168 = arith.addf %162, %167 : vector<1x7x8x128xf32>
    %169 = vector.extract_strided_slice %47 {offsets = [18, 0], sizes = [1, 128], strides = [1, 1]} : vector<25x128xf32> to vector<1x128xf32>
    %170 = vector.shape_cast %169 : vector<1x128xf32> to vector<1x1x1x128xf32>
    %171 = vector.extract_strided_slice %150 {offsets = [0, 3, 0, 0], sizes = [1, 7, 8, 128], strides = [1, 1, 1, 1]} : vector<1x11x8x128xf32> to vector<1x7x8x128xf32>
    %172 = vector.broadcast %170 : vector<1x1x1x128xf32> to vector<1x7x8x128xf32>
    %173 = arith.mulf %171, %172 : vector<1x7x8x128xf32>
    %174 = arith.addf %168, %173 : vector<1x7x8x128xf32>
    %175 = vector.extract_strided_slice %47 {offsets = [23, 0], sizes = [1, 128], strides = [1, 1]} : vector<25x128xf32> to vector<1x128xf32>
    %176 = vector.shape_cast %175 : vector<1x128xf32> to vector<1x1x1x128xf32>
    %177 = vector.extract_strided_slice %150 {offsets = [0, 4, 0, 0], sizes = [1, 7, 8, 128], strides = [1, 1, 1, 1]} : vector<1x11x8x128xf32> to vector<1x7x8x128xf32>
    %178 = vector.broadcast %176 : vector<1x1x1x128xf32> to vector<1x7x8x128xf32>
    %179 = arith.mulf %177, %178 : vector<1x7x8x128xf32>
    %180 = arith.addf %174, %179 : vector<1x7x8x128xf32>
    %181 = vector.extract_strided_slice %46 {offsets = [4, 0], sizes = [176, 128], strides = [1, 1]} : vector<184x128xf32> to vector<176x128xf32>
    %182 = vector.shape_cast %181 : vector<176x128xf32> to vector<1x11x16x128xf32>
    %183 = vector.extract_strided_slice %182 {offsets = [0, 0, 0, 0], sizes = [1, 11, 8, 128], strides = [1, 1, 1, 1]} : vector<1x11x16x128xf32> to vector<1x11x8x128xf32>
    %184 = vector.extract_strided_slice %47 {offsets = [4, 0], sizes = [1, 128], strides = [1, 1]} : vector<25x128xf32> to vector<1x128xf32>
    %185 = vector.shape_cast %184 : vector<1x128xf32> to vector<1x1x1x128xf32>
    %186 = vector.extract_strided_slice %183 {offsets = [0, 0, 0, 0], sizes = [1, 7, 8, 128], strides = [1, 1, 1, 1]} : vector<1x11x8x128xf32> to vector<1x7x8x128xf32>
    %187 = vector.broadcast %185 : vector<1x1x1x128xf32> to vector<1x7x8x128xf32>
    %188 = arith.mulf %186, %187 : vector<1x7x8x128xf32>
    %189 = arith.addf %180, %188 : vector<1x7x8x128xf32>
    %190 = vector.extract_strided_slice %47 {offsets = [9, 0], sizes = [1, 128], strides = [1, 1]} : vector<25x128xf32> to vector<1x128xf32>
    %191 = vector.shape_cast %190 : vector<1x128xf32> to vector<1x1x1x128xf32>
    %192 = vector.extract_strided_slice %183 {offsets = [0, 1, 0, 0], sizes = [1, 7, 8, 128], strides = [1, 1, 1, 1]} : vector<1x11x8x128xf32> to vector<1x7x8x128xf32>
    %193 = vector.broadcast %191 : vector<1x1x1x128xf32> to vector<1x7x8x128xf32>
    %194 = arith.mulf %192, %193 : vector<1x7x8x128xf32>
    %195 = arith.addf %189, %194 : vector<1x7x8x128xf32>
    %196 = vector.extract_strided_slice %47 {offsets = [14, 0], sizes = [1, 128], strides = [1, 1]} : vector<25x128xf32> to vector<1x128xf32>
    %197 = vector.shape_cast %196 : vector<1x128xf32> to vector<1x1x1x128xf32>
    %198 = vector.extract_strided_slice %183 {offsets = [0, 2, 0, 0], sizes = [1, 7, 8, 128], strides = [1, 1, 1, 1]} : vector<1x11x8x128xf32> to vector<1x7x8x128xf32>
    %199 = vector.broadcast %197 : vector<1x1x1x128xf32> to vector<1x7x8x128xf32>
    %200 = arith.mulf %198, %199 : vector<1x7x8x128xf32>
    %201 = arith.addf %195, %200 : vector<1x7x8x128xf32>
    %202 = vector.extract_strided_slice %47 {offsets = [19, 0], sizes = [1, 128], strides = [1, 1]} : vector<25x128xf32> to vector<1x128xf32>
    %203 = vector.shape_cast %202 : vector<1x128xf32> to vector<1x1x1x128xf32>
    %204 = vector.extract_strided_slice %183 {offsets = [0, 3, 0, 0], sizes = [1, 7, 8, 128], strides = [1, 1, 1, 1]} : vector<1x11x8x128xf32> to vector<1x7x8x128xf32>
    %205 = vector.broadcast %203 : vector<1x1x1x128xf32> to vector<1x7x8x128xf32>
    %206 = arith.mulf %204, %205 : vector<1x7x8x128xf32>
    %207 = arith.addf %201, %206 : vector<1x7x8x128xf32>
    %208 = vector.extract_strided_slice %47 {offsets = [24, 0], sizes = [1, 128], strides = [1, 1]} : vector<25x128xf32> to vector<1x128xf32>
    %209 = vector.shape_cast %208 : vector<1x128xf32> to vector<1x1x1x128xf32>
    %210 = vector.extract_strided_slice %183 {offsets = [0, 4, 0, 0], sizes = [1, 7, 8, 128], strides = [1, 1, 1, 1]} : vector<1x11x8x128xf32> to vector<1x7x8x128xf32>
    %211 = vector.broadcast %209 : vector<1x1x1x128xf32> to vector<1x7x8x128xf32>
    %212 = arith.mulf %210, %211 : vector<1x7x8x128xf32>
    %213 = arith.addf %207, %212 : vector<1x7x8x128xf32>
    %c0_20 = arith.constant 0 : index
    %c0_21 = arith.constant 0 : index
    %c0_22 = arith.constant 0 : index
    %c0_23 = arith.constant 0 : index
    %214 = vector.load %arg6[%c0_20, %c0_21, %c0_22, %c0_23] : memref<1x7x8x128xf32, #tpu.memory_space<vmem>>, vector<1x7x8x128xf32>
    tpu.vector_store %arg6[%c0_20, %c0_21, %c0_22, %c0_23], %213 {strides = array<i32>} : memref<1x7x8x128xf32, #tpu.memory_space<vmem>>, vector<1x7x8x128xf32>,
    return
  }
  func.func @transform_0(%arg0: i32) -> (i32, i32) {
    %c0_i32 = arith.constant 0 : i32
    %c0_i32_0 = arith.constant 0 : i32
    %c0_i32_1 = arith.constant 0 : i32
    return %c0_i32, %c0_i32_0 : i32, i32
  }
  func.func @transform_1(%arg0: i32) -> (i32, i32) {
    %c0_i32 = arith.constant 0 : i32
    %c0_i32_0 = arith.constant 0 : i32
    return %c0_i32, %arg0 : i32, i32
  }
  func.func @transform_2(%arg0: i32) -> (i32, i32) {
    %c0_i32 = arith.constant 0 : i32
    %c0_i32_0 = arith.constant 0 : i32
    return %c0_i32, %arg0 : i32, i32
  }
  func.func @transform_3(%arg0: i32) -> (i32, i32) {
    %c0_i32 = arith.constant 0 : i32
    %c0_i32_0 = arith.constant 0 : i32
    return %c0_i32, %arg0 : i32, i32
  }
  func.func @transform_4(%arg0: i32) -> (i32, i32) {
    %c0_i32 = arith.constant 0 : i32
    %c0_i32_0 = arith.constant 0 : i32
    return %c0_i32, %arg0 : i32, i32
  }
  func.func @transform_5(%arg0: i32) -> (i32, i32, i32, i32) {
    %c0_i32 = arith.constant 0 : i32
    %c0_i32_0 = arith.constant 0 : i32
    %c0_i32_1 = arith.constant 0 : i32
    %c0_i32_2 = arith.constant 0 : i32
    return %c0_i32, %c0_i32_0, %c0_i32_1, %arg0 : i32, i32, i32, i32
  }
}

</mosaic_0001>

<bundles_post_ra>
// kernel: forward.1
= control target key start
LH: loop header
LB: loop body
LE: loop exit
PB: predicated region body
PF: predicated region fallthrough
CT: control target
= control target key end

     0   :  { %s2069_s18 = smov 0   ;;  %s2071_s19 = smov 0   ;;  %s2903_s0 = inlined_call_operand.vmem [shape: bf16[176,192], index: 0, kind: input, shape index: {}]   ;;  %s2904_s1 = inlined_call_operand.vmem [shape: bf16[192,1152], index: 1, kind: input, shape index: {}]   ;;  %s2905_s2 = inlined_call_operand.vmem [shape: f32[1,1152], index: 2, kind: input, shape index: {}]   ;;  %s2906_s3 = inlined_call_operand.vmem [shape: f32[1,1152], index: 3, kind: input, shape index: {}]   ;;  %s2907_s4 = inlined_call_operand.vmem [shape: f32[25,1152], index: 4, kind: input, shape index: {}]   ;;  %s2908_s5 = inlined_call_operand.vmem [shape: f32[1,7,8,1152], index: 5, kind: output, shape index: {}]  }
   0x1   :  { %s2073_s20 = smov 0  }
   0x2 LB: > { %s2085_s21 = sadd.s32 4294967295, %s2036_s20   ;;  %s2088_s22 = sadd.s32 1, %s2036_s20   ;;  %s2036_s20 = sphi %s2073_s20, %s2913_s20   ;;  %s2032_s19 = sphi %s2071_s19, %s2912_s19   ;;  %s2028_s18 = sphi %s2069_s18, %s2911_s18  }
   0x3   : > { %s40_s23 = ssub.s32 %s2036_s20, %s2088_s22  ;;  %s43_s24 = sadd.s32 1, %s2032_s19 }
   0x4   : > { %p41_p0 = scmp.eq.s32.totalorder %s40_s23, 0  ;;  %p50_p1 = scmp.ne.s32.totalorder %s2032_s19, %s2028_s18 }
   0x5   : > { %p51_p2 = scmp.eq.s32.totalorder %s2036_s20, 0  ;;  %p158_p3 = scmp.eq.s32.totalorder %s2085_s21, 8 }
   0x6   : > { %s2098_s25 = scalar_select %p41_p0, %s2032_s19, %s43_s24  }
   0x7   : > { %p2100_p4 = por %p51_p2, %p50_p1  ;;  %p2104_p5 = por %p158_p3, %p50_p1 }
   0x8   : > { %p1781_p6 = scmp.ge.s32.totalorder %s2036_s20, 9 }
   0xa   : > { %183 = sbr.rel (%p1781_p6) target bundleno = 52 (0x34), region = 20 }
   0xf   : > { %186 = sbr.rel (!%p2100_p4) target bundleno = 44 (0x2c), region = 24  ;;  %s188_s28 = sand.u32 (%p2100_p4), 1, %s2032_s19  }
  0x10   : > { %s1782_s29 = sshll.u32 (%p2100_p4), %s2036_s20, 2  ;;  %s1983_s30 = smul.u32 (%p2100_p4), 96, %s188_s28 }
  0x11   : > { %s2116_s8 = scalar_lea.vmem (%p2100_p4), %s2904_s1, %s1782_s29 }
  0x12   : > { %v209_v0 = vld [vmem:[%s2116_s8] sm:$0xf] (%p2100_p4)  ;;  %v211_v1 = vld [vmem:[%s2116_s8 + $0x24] sm:$0xf] (%p2100_p4)  ;;  %v213_v2 = vld [vmem:[%s2116_s8 + $0x48] sm:$0xf] (%p2100_p4) }
  0x13   : > { %s2121_s9 = scalar_lea.vmem (%p2100_p4), [#allocation2], %s1983_s30  ;;  %v215_v3 = vld [vmem:[%s2116_s8 + $0x6c] sm:$0xf] (%p2100_p4)  ;;  %v217_v4 = vld [vmem:[%s2116_s8 + $0x90] sm:$0xf] (%p2100_p4) }
  0x14   : > { %210 = vst [vmem:[%s2121_s9] sm:$0xf] %v209_v0  ;;  %v219_v5 = vld [vmem:[%s2116_s8 + $0xb4] sm:$0xf]  ;;  %v221_v6 = vld [vmem:[%s2116_s8 + $0xd8] sm:$0xf] }
  0x15   : > { %212 = vst [vmem:[%s2121_s9 + $0x4] sm:$0xf] %v211_v1  ;;  %v223_v7 = vld [vmem:[%s2116_s8 + $0xfc] sm:$0xf]  ;;  %v225_v8 = vld [vmem:[%s2116_s8 + $0x120] sm:$0xf] }
  0x16   : > { %214 = vst [vmem:[%s2121_s9 + $0x8] sm:$0xf] %v213_v2  ;;  %v227_v9 = vld [vmem:[%s2116_s8 + $0x144] sm:$0xf]  ;;  %v229_v10 = vld [vmem:[%s2116_s8 + $0x168] sm:$0xf] }
  0x17   : > { %216 = vst [vmem:[%s2121_s9 + $0xc] sm:$0xf] %v215_v3  ;;  %v231_v11 = vld [vmem:[%s2116_s8 + $0x18c] sm:$0xf]  ;;  %v233_v12 = vld [vmem:[%s2116_s8 + $0x1b0] sm:$0xf] }
  0x18   : > { %218 = vst [vmem:[%s2121_s9 + $0x10] sm:$0xf] %v217_v4  ;;  %v235_v13 = vld [vmem:[%s2116_s8 + $0x1d4] sm:$0xf]  ;;  %v237_v14 = vld [vmem:[%s2116_s8 + $0x1f8] sm:$0xf] }
  0x19   : > { %220 = vst [vmem:[%s2121_s9 + $0x14] sm:$0xf] %v219_v5  ;;  %v239_v15 = vld [vmem:[%s2116_s8 + $0x21c] sm:$0xf]  ;;  %v241_v16 = vld [vmem:[%s2116_s8 + $0x240] sm:$0xf] }
  0x1a   : > { %222 = vst [vmem:[%s2121_s9 + $0x18] sm:$0xf] %v221_v6  ;;  %v243_v17 = vld [vmem:[%s2116_s8 + $0x264] sm:$0xf]  ;;  %v245_v18 = vld [vmem:[%s2116_s8 + $0x288] sm:$0xf] }
  0x1b   : > { %224 = vst [vmem:[%s2121_s9 + $0x1c] sm:$0xf] %v223_v7  ;;  %v247_v19 = vld [vmem:[%s2116_s8 + $0x2ac] sm:$0xf]  ;;  %v249_v20 = vld [vmem:[%s2116_s8 + $0x2d0] sm:$0xf] }
  0x1c   : > { %226 = vst [vmem:[%s2121_s9 + $0x20] sm:$0xf] %v225_v8  ;;  %v251_v21 = vld [vmem:[%s2116_s8 + $0x2f4] sm:$0xf]  ;;  %v253_v22 = vld [vmem:[%s2116_s8 + $0x318] sm:$0xf] }
  0x1d   : > { %228 = vst [vmem:[%s2121_s9 + $0x24] sm:$0xf] %v227_v9  ;;  %v255_v23 = vld [vmem:[%s2116_s8 + $0x33c] sm:$0xf] }
  0x1e   : > { %230 = vst [vmem:[%s2121_s9 + $0x28] sm:$0xf] %v229_v10 }
  0x1f   : > { %232 = vst [vmem:[%s2121_s9 + $0x2c] sm:$0xf] %v231_v11 }
  0x20   : > { %234 = vst [vmem:[%s2121_s9 + $0x30] sm:$0xf] %v233_v12 }
  0x21   : > { %236 = vst [vmem:[%s2121_s9 + $0x34] sm:$0xf] %v235_v13 }
  0x22   : > { %238 = vst [vmem:[%s2121_s9 + $0x38] sm:$0xf] %v237_v14 }
  0x23   : > { %240 = vst [vmem:[%s2121_s9 + $0x3c] sm:$0xf] %v239_v15 }
  0x24   : > { %242 = vst [vmem:[%s2121_s9 + $0x40] sm:$0xf] %v241_v16 }
  0x25   : > { %244 = vst [vmem:[%s2121_s9 + $0x44] sm:$0xf] %v243_v17 }
  0x26   : > { %246 = vst [vmem:[%s2121_s9 + $0x48] sm:$0xf] %v245_v18 }
  0x27   : > { %248 = vst [vmem:[%s2121_s9 + $0x4c] sm:$0xf] %v247_v19 }
  0x28   : > { %250 = vst [vmem:[%s2121_s9 + $0x50] sm:$0xf] %v249_v20 }
  0x29   : > { %252 = vst [vmem:[%s2121_s9 + $0x54] sm:$0xf] %v251_v21 }
  0x2a   : > { %254 = vst [vmem:[%s2121_s9 + $0x58] sm:$0xf] %v253_v22 }
  0x2b   : > { %256 = vst [vmem:[%s2121_s9 + $0x5c] sm:$0xf] %v255_v23 }
  0x2c PF: > { %340 = sbr.rel (!%p2100_p4) target bundleno = 52 (0x34), region = 73  ;;  %s342_s10 = sand.u32 (%p2100_p4), 1, %s2032_s19  }
  0x2d   : > { %s1784_s11 = sshll.u32 (%p2100_p4), %s2036_s20, 3  ;;  %s1783_s12 = sshll.u32 (%p2100_p4), %s342_s10, 5 }
  0x2e   : > { %s346_s15 = scalar_lea.vmem (%p2100_p4), %s2907_s4, %s1784_s11  ;;  %s344_s16 = scalar_lea.vmem (%p2100_p4), [#allocation3], %s1783_s12 }
  0x2f   : > { %v381_v24 = vld [vmem:[%s346_s15] sm:$0xff] (%p2100_p4)  ;;  %v383_v25 = vld [vmem:[%s346_s15 + $0x48] sm:$0xff] (%p2100_p4)  ;;  %v385_v26 = vld [vmem:[%s346_s15 + $0x90] sm:$0xff] (%p2100_p4) }
  0x30   : > { %382 = vst [vmem:[%s344_s16] sm:$0xff] (%p2100_p4), %v381_v24  ;;  %v387_v27 = vld [vmem:[%s346_s15 + $0xd8] sm:$0xff] (%p2100_p4) }
  0x31   : > { %384 = vst [vmem:[%s344_s16 + $0x8] sm:$0xff] %v383_v25 }
  0x32   : > { %386 = vst [vmem:[%s344_s16 + $0x10] sm:$0xff] %v385_v26 }
  0x33   : > { %388 = vst [vmem:[%s344_s16 + $0x18] sm:$0xff] %v387_v27 }
  0x34 PF: > { %p1785_p7 = scmp.ge.s32.totalorder %s2036_s20, 1  ;;  %p393_p8 = scmp.lt.s32.totalorder %s2036_s20, 10 }
  0x36   : > { %p394_p9 = pnand %p1785_p7, %p393_p8 }
  0x37   : > { %s2178_s17 = sand.u32 (!%p394_p9), 1, %s2028_s18   ;;  %p443_p10 = scmp.lt.s32.totalorder (!%p394_p9), %s2085_s21, 8 }
  0x38   : > { %397 = sbr.rel (%p394_p9) target bundleno = 500 (0x1f4), region = 111  ;;  %s1786_s12 = sshll.u32 (!%p394_p9), %s2178_s17, 5 }
  0x39   : > { %s1984_s23 = smul.u32 (!%p394_p9), 96, %s2178_s17  ;;  %s2339_s13 = scalar_lea.vmem (!%p394_p9), [#allocation3], %s1786_s12 }
  0x3a   : > { %s1985_s26 = smul.u32 (!%p394_p9), 56, %s2178_s17 }
  0x3b   : > { %s2181_s24 = scalar_lea.vmem (!%p394_p9), [#allocation2], %s1984_s23 }
  0x3c   : > { %s442_s17 = scalar_lea.vmem (!%p394_p9), [#allocation4], %s1985_s26 }
  0x3d   : > { %v1966_v28 = vld [vmem:[%s2181_s24 + $0x38] sm:$0xff]  ;;  %v1965_v30 = vld [vmem:[%s2181_s24 + $0x30] sm:$0xff]  ;;  %v1964_v32 = vld [vmem:[%s2181_s24 + $0x28] sm:$0xff]  ;;  %vm667_vm0 = vcmask 523264   ;;  %s444_s14 = scalar_select %p443_p10, %s2085_s21, 8  ;;  %vm1133_vm6 = vcmask 1046528  }
  0x3e   : > { %v1970_v29 = vld [vmem:[%s2181_s24 + $0x58] sm:$0xff]  ;;  %701 = vmatpush.bf16.msra.mxu0 %v1966_v28  ;;  %1971 = vmatpush.bf16.msra.mxu2 %v1966_v28  ;;  %v1969_v31 = vld [vmem:[%s2181_s24 + $0x50] sm:$0xff]  ;;  %v1968_v33 = vld [vmem:[%s2181_s24 + $0x48] sm:$0xff]  ;;  %vm1253_vm7 = vcmask 1045504   ;;  %vm1373_vm8 = vcmask 1044480   ;;  %vm1493_vm9 = vcmask 1043456  }
  0x3f   : > { %769 = vmatpush.bf16.msra.mxu1 %v1970_v29  ;;  %1979 = vmatpush.bf16.msra.mxu3 %v1970_v29  ;;  %v1963_v34 = vld [vmem:[%s2181_s24 + $0x20] sm:$0xff]  ;;  %v1791_v37 = vld [vmem:[%s2903_s0 + $0x8] sm:$0xf0]  ;;  %v1962_v41 = vld [vmem:[%s2181_s24 + $0x18] sm:$0xff]  ;;  %s445_s23 = scalar_lea.vmem %s2905_s2, %s444_s14  ;;  %s1934_s28 = sshll.u32 (%p2104_p5), %s2085_s21, 3 }
  0x40   : > { %v1967_v35 = vld [vmem:[%s2181_s24 + $0x40] sm:$0xff]  ;;  %v1839_v39 = vld [vmem:[%s2903_s0 + $0x68] sm:$0xf0]  ;;  %v1961_v43 = vld [vmem:[%s2181_s24 + $0x10] sm:$0xff]  ;;  %s1628_s6 = scalar_lea.vmem (%p2104_p5), %s2908_s5, %s1934_s28 }
  0x41   : > { %v1937_v36 = vld [vmem:[%s2903_s0 + $0x4] sm:$0xf]  ;;  %v1960_v44 = vld [vmem:[%s2181_s24 + $0x8] sm:$0xff]  ;;  %v1789_v45 = vld [vmem:[%s2903_s0] sm:$0xf] }
  0x42   : > { %702 = vmatpush.bf16.msra.mxu0 %v1965_v30  ;;  %1972 = vmatpush.bf16.msra.mxu2 %v1965_v30  ;;  %v1949_v38 = vld [vmem:[%s2903_s0 + $0x64] sm:$0xf]  ;;  %v1794_v40 = vor.u32 %v1937_v36, %v1791_v37  ;;  %v1938_v47 = vld [vmem:[%s2903_s0 + $0x4] sm:$0xf0]  ;;  %v1829_v48 = vld [vmem:[%s2903_s0 + $0x50] sm:$0xf] }
  0x43   : > { %770 = vmatpush.bf16.msra.mxu1 %v1969_v31  ;;  %1980 = vmatpush.bf16.msra.mxu3 %v1969_v31  ;;  %v1842_v42 = vor.u32 %v1949_v38, %v1839_v39  ;;  %v1959_v46 = vld [vmem:[%s2181_s24] sm:$0xff]  ;;  %v1948_v49 = vld [vmem:[%s2903_s0 + $0x54] sm:$0xf0]  ;;  %v1939_v50 = vld [vmem:[%s2903_s0 + $0x14] sm:$0xf]  ;;  %v1790_v54 = vor.u32 %v1938_v47, %v1789_v45  ;;  %s448_s24 = scalar_lea.vmem %s2906_s3, %s444_s14 }
  0x44   : > { %v1799_v51 = vld [vmem:[%s2903_s0 + $0x18] sm:$0xf0]  ;;  %v1951_v52 = vld [vmem:[%s2903_s0 + $0x74] sm:$0xf]  ;;  %v1830_v55 = vor.u32 %v1948_v49, %v1829_v48  ;;  %v1797_v58 = vld [vmem:[%s2903_s0 + $0x10] sm:$0xf] }
  0x45   : > { %v1847_v53 = vld [vmem:[%s2903_s0 + $0x78] sm:$0xf0]  ;;  %v1802_v56 = vor.u32 %v1939_v50, %v1799_v51  ;;  %v1940_v59 = vld [vmem:[%s2903_s0 + $0x14] sm:$0xf0]  ;;  %v1837_v60 = vld [vmem:[%s2903_s0 + $0x60] sm:$0xf] }
  0x46   : > { %703 = vmatpush.bf16.msra.mxu0 %v1964_v32  ;;  %1973 = vmatpush.bf16.msra.mxu2 %v1964_v32  ;;  %v1850_v57 = vor.u32 %v1951_v52, %v1847_v53  ;;  %v1950_v61 = vld [vmem:[%s2903_s0 + $0x64] sm:$0xf0]  ;;  %v1941_v62 = vld [vmem:[%s2903_s0 + $0x24] sm:$0xf]  ;;  %v1807_v63 = vld [vmem:[%s2903_s0 + $0x28] sm:$0xf0]  ;;  %v1798_v2 = vor.u32 %v1940_v59, %v1797_v58 }
  0x47   : > { %771 = vmatpush.bf16.msra.mxu1 %v1968_v33  ;;  %1981 = vmatpush.bf16.msra.mxu3 %v1968_v33  ;;  %v1953_v0 = vld [vmem:[%s2903_s0 + $0x84] sm:$0xf]  ;;  %v1855_v1 = vld [vmem:[%s2903_s0 + $0x88] sm:$0xf0]  ;;  %v1838_v3 = vor.u32 %v1950_v61, %v1837_v60  ;;  %v1810_v4 = vor.u32 %v1941_v62, %v1807_v63  ;;  %v1805_v6 = vld [vmem:[%s2903_s0 + $0x20] sm:$0xf] }
  0x48   : > { %v1858_v5 = vor.u32 %v1953_v0, %v1855_v1  ;;  %v1942_v7 = vld [vmem:[%s2903_s0 + $0x24] sm:$0xf0]  ;;  %v1845_v8 = vld [vmem:[%s2903_s0 + $0x70] sm:$0xf]  ;;  %v1952_v9 = vld [vmem:[%s2903_s0 + $0x74] sm:$0xf0] }
  0x49   : > { %v1943_v10 = vld [vmem:[%s2903_s0 + $0x34] sm:$0xf]  ;;  %v1815_v11 = vld [vmem:[%s2903_s0 + $0x38] sm:$0xf0]  ;;  %v1806_v14 = vor.u32 %v1942_v7, %v1805_v6  ;;  %v1846_v15 = vor.u32 %v1952_v9, %v1845_v8  ;;  %v1813_v18 = vld [vmem:[%s2903_s0 + $0x30] sm:$0xf] }
  0x4a   : > { %704 = vmatpush.bf16.msra.mxu0 %v1963_v34  ;;  %1974 = vmatpush.bf16.msra.mxu2 %v1963_v34  ;;  %v1955_v12 = vld [vmem:[%s2903_s0 + $0x94] sm:$0xf]  ;;  %v1863_v13 = vld [vmem:[%s2903_s0 + $0x98] sm:$0xf0]  ;;  %v1818_v16 = vor.u32 %v1943_v10, %v1815_v11  ;;  %v1944_v19 = vld [vmem:[%s2903_s0 + $0x34] sm:$0xf0] }
  0x4b   : > { %772 = vmatpush.bf16.msra.mxu1 %v1967_v35  ;;  %1982 = vmatpush.bf16.msra.mxu3 %v1967_v35  ;;  %v1866_v17 = vor.u32 %v1955_v12, %v1863_v13  ;;  %v1853_v20 = vld [vmem:[%s2903_s0 + $0x80] sm:$0xf]  ;;  %v1954_v21 = vld [vmem:[%s2903_s0 + $0x84] sm:$0xf0]  ;;  %v1945_v22 = vld [vmem:[%s2903_s0 + $0x44] sm:$0xf]  ;;  %v1814_v26 = vor.u32 %v1944_v19, %v1813_v18 }
  0x4c   : > { %v1823_v23 = vld [vmem:[%s2903_s0 + $0x48] sm:$0xf0]  ;;  %v1957_v24 = vld [vmem:[%s2903_s0 + $0xa4] sm:$0xf]  ;;  %v1854_v27 = vor.u32 %v1954_v21, %v1853_v20  ;;  %v1821_v30 = vld [vmem:[%s2903_s0 + $0x40] sm:$0xf] }
  0x4d   : > { %v1871_v25 = vld [vmem:[%s2903_s0 + $0xa8] sm:$0xf0]  ;;  %v1826_v28 = vor.u32 %v1945_v22, %v1823_v23  ;;  %v1946_v31 = vld [vmem:[%s2903_s0 + $0x44] sm:$0xf0]  ;;  %v1861_v32 = vld [vmem:[%s2903_s0 + $0x90] sm:$0xf] }
  0x4e   : > { %1923 = vmatmul.msk.bf16.vlgmr.msra.gmra.mxu1 %vm667_vm0, %v1794_v40  ;;  %705 = vmatpush.bf16.msra.mxu0 %v1962_v41  ;;  %v1874_v29 = vor.u32 %v1957_v24, %v1871_v25  ;;  %v1956_v33 = vld [vmem:[%s2903_s0 + $0x94] sm:$0xf0]  ;;  %v1947_v34 = vld [vmem:[%s2903_s0 + $0x54] sm:$0xf]  ;;  %v1831_v35 = vld [vmem:[%s2903_s0 + $0x58] sm:$0xf0]  ;;  %v1822_v36 = vor.u32 %v1946_v31, %v1821_v30 }
  0x4f   : > { %1975 = vmatpush.bf16.msra.mxu2 %v1962_v41  ;;  %1929 = vmatmul.msk.bf16.vlgmr.msra.gmra.mxu3 %vm667_vm0, %v1842_v42  ;;  %v1862_v37 = vor.u32 %v1956_v33, %v1861_v32  ;;  %v1834_v38 = vor.u32 %v1947_v34, %v1831_v35  ;;  %v1869_v39 = vld [vmem:[%s2903_s0 + $0xa0] sm:$0xf]  ;;  %v1958_v40 = vld [vmem:[%s2903_s0 + $0xa4] sm:$0xf0] }
  0x50   : > { %v1870_v41 = vor.u32 %v1958_v40, %v1869_v39 }
  0x52   : > { %706 = vmatpush.bf16.msra.mxu0 %v1961_v43 }
  0x53   : > { %1976 = vmatpush.bf16.msra.mxu2 %v1961_v43 }
  0x56   : > { %707 = vmatpush.bf16.msra.mxu0 %v1960_v44 }
  0x57   : > { %1977 = vmatpush.bf16.msra.mxu2 %v1960_v44 }
  0x5a   : > { %708 = vmatpush.bf16.msra.mxu0 %v1959_v46 }
  0x5b   : > { %1978 = vmatpush.bf16.msra.mxu2 %v1959_v46 }
  0x5d   : > { %709 = vmatmul.bf16.vlgmr.msra.gmra.mxu0 %v1790_v54 }
  0x5e   : > { %734 = vmatmul.bf16.vlgmr.msra.gmra.mxu2 %v1830_v55  ;;  %1924 = vmatmul.msk.bf16.gmra.mxu1 %vm667_vm0, %v1802_v56 }
  0x5f   : > { %1930 = vmatmul.msk.bf16.gmra.mxu3 %vm667_vm0, %v1850_v57 }
  0x6d   : > { %714 = vmatmul.bf16.gmra.mxu0 %v1798_v2 }
  0x6e   : > { %739 = vmatmul.bf16.gmra.mxu2 %v1838_v3  ;;  %1925 = vmatmul.msk.bf16.gmra.mxu1 %vm667_vm0, %v1810_v4 }
  0x6f   : > { %1931 = vmatmul.msk.bf16.gmra.mxu3 %vm667_vm0, %v1858_v5 }
  0x7d   : > { %719 = vmatmul.bf16.gmra.mxu0 %v1806_v14 }
  0x7e   : > { %744 = vmatmul.bf16.gmra.mxu2 %v1846_v15  ;;  %1926 = vmatmul.msk.bf16.gmra.mxu1 %vm667_vm0, %v1818_v16 }
  0x7f   : > { %1932 = vmatmul.msk.bf16.gmra.mxu3 %vm667_vm0, %v1866_v17 }
  0x8d   : > { %724 = vmatmul.bf16.gmra.mxu0 %v1814_v26 }
  0x8e   : > { %749 = vmatmul.bf16.gmra.mxu2 %v1854_v27  ;;  %1927 = vmatmul.msk.bf16.gmra.mxu1 %vm667_vm0, %v1826_v28 }
  0x8f   : > { %1933 = vmatmul.msk.bf16.gmra.mxu3 %vm667_vm0, %v1874_v29 }
  0x9d   : > { %729 = vmatmul.bf16.gmra.mxu0 %v1822_v36 }
  0x9e   : > { %754 = vmatmul.bf16.gmra.mxu2 %v1862_v37  ;;  %1928 = vmatmul.msk.bf16.gmra.mxu1 %vm667_vm0, %v1834_v38 }
  0xae   : > { %759 = vmatmul.bf16.gmra.mxu2 %v1870_v41 }
  0xcb   : > { %v774_v42 = vpop.f32.mrf.mxu1 }
  0xd2   : > { %v2341_v46 = vpop.f32.mrf.mxu3 }
  0xd3   : > { %v776_v43 = vpop.f32.mrf.mxu1 }
  0xda   : > { %v710_v44 = vpop.f32.mrf.mxu0  ;;  %v2347_v51 = vpop.f32.mrf.mxu3 }
  0xdb   : > { %v779_v45 = vpop.f32.mrf.mxu1  ;;  %v775_v6 = vadd.f32 %v774_v42, %v710_v44 }
  0xdd   : > { %v856_v14 = vmul.f32 %v775_v6, %v775_v6 }
  0xe1   : > { %v2343_v47 = vpop.f32.mrf.mxu2 }
  0xe2   : > { %v712_v48 = vpop.f32.mrf.mxu0  ;;  %v2351_v57 = vpop.f32.mrf.mxu3 }
  0xe3   : > { %v781_v49 = vpop.f32.mrf.mxu1  ;;  %v777_v5 = vadd.f32 %v776_v43, %v712_v48 }
  0xe5   : > { %v857_v11 = vmul.f32 %v777_v5, %v777_v5  ;;  %v829_v15 = vadd.f32 %v777_v5, %v775_v6 }
  0xe7   : > { %v878_v18 = vadd.f32 %v857_v11, %v856_v14 }
  0xe9   : > { %v2345_v50 = vpop.f32.mrf.mxu2 }
  0xea   : > { %v715_v52 = vpop.f32.mrf.mxu0  ;;  %v2355_v61 = vpop.f32.mrf.mxu3 }
  0xeb   : > { %v784_v53 = vpop.f32.mrf.mxu1  ;;  %v780_v7 = vadd.f32 %v779_v45, %v715_v52 }
  0xed   : > { %v858_v16 = vmul.f32 %v780_v7, %v780_v7  ;;  %v830_v19 = vadd.f32 %v829_v15, %v780_v7 }
  0xef   : > { %v879_v22 = vadd.f32 %v878_v18, %v858_v16 }
  0xf1   : > { %v2349_v54 = vpop.f32.mrf.mxu2 }
  0xf2   : > { %v717_v55 = vpop.f32.mrf.mxu0  ;;  %v2359_v1 = vpop.f32.mrf.mxu3 }
  0xf3   : > { %v786_v56 = vpop.f32.mrf.mxu1  ;;  %v782_v12 = vadd.f32 %v781_v49, %v717_v55 }
  0xf5   : > { %v859_v20 = vmul.f32 %v782_v12, %v782_v12  ;;  %v831_v23 = vadd.f32 %v830_v19, %v782_v12 }
  0xf7   : > { %v880_v28 = vadd.f32 %v879_v22, %v859_v20 }
  0xf9   : > { %v2353_v58 = vpop.f32.mrf.mxu2 }
  0xfa   : > { %v720_v59 = vpop.f32.mrf.mxu0  ;;  %v2365_v9 = vpop.f32.mrf.mxu3  ;;  %v2412_v6 = vadd.f32 %v2347_v51, %v2353_v58 }
  0xfb   : > { %v789_v60 = vpop.f32.mrf.mxu1  ;;  %v2367_v17 = vadd.f32 %v784_v53, %v720_v59 }
  0xfc   : > { %v869_v51 = vmul.f32 %v2412_v6, %v2412_v6 }
  0xfd   : > { %v860_v24 = vmul.f32 %v2367_v17, %v2367_v17  ;;  %v832_v29 = vadd.f32 %v831_v23, %v2367_v17 }
  0xff   : > { %v881_v34 = vadd.f32 %v880_v28, %v860_v24 }
 0x101   : > { %v2357_v62 = vpop.f32.mrf.mxu2 }
 0x102   : > { %v722_v63 = vpop.f32.mrf.mxu0  ;;  %v819_v33 = vpop.f32.mrf.mxu3 }
 0x103   : > { %v791_v0 = vpop.f32.mrf.mxu1  ;;  %v2369_v21 = vadd.f32 %v786_v56, %v722_v63 }
 0x105   : > { %v861_v30 = vmul.f32 %v2369_v21, %v2369_v21  ;;  %v833_v35 = vadd.f32 %v832_v29, %v2369_v21 }
 0x107   : > { %v882_v38 = vadd.f32 %v881_v34, %v861_v30 }
 0x109   : > { %v2361_v2 = vpop.f32.mrf.mxu2 }
 0x10a   : > { %v725_v3 = vpop.f32.mrf.mxu0  ;;  %v2428_v58 = vadd.f32 %v2355_v61, %v2361_v2 }
 0x10b   : > { %v794_v4 = vpop.f32.mrf.mxu1  ;;  %v2373_v25 = vadd.f32 %v789_v60, %v725_v3  ;;  %v2405_v3 = vadd.f32 %v2341_v46, %v2349_v54  ;;  %v2421_v54 = vadd.f32 %v2351_v57, %v2357_v62 }
 0x10c   : > { %v871_v20 = vmul.f32 %v2428_v58, %v2428_v58 }
 0x10d   : > { %v862_v36 = vmul.f32 %v2373_v25, %v2373_v25  ;;  %v834_v39 = vadd.f32 %v833_v35, %v2373_v25  ;;  %v868_v46 = vmul.f32 %v2405_v3, %v2405_v3  ;;  %v870_v16 = vmul.f32 %v2421_v54, %v2421_v54 }
 0x10f   : > { %v883_v41 = vadd.f32 %v882_v38, %v862_v36 }
 0x111   : > { %v2363_v8 = vpop.f32.mrf.mxu2 }
 0x112   : > { %v727_v10 = vpop.f32.mrf.mxu0  ;;  %v2435_v57 = vadd.f32 %v2359_v1, %v2363_v8 }
 0x113   : > { %v796_v13 = vpop.f32.mrf.mxu1  ;;  %v2378_v31 = vadd.f32 %v791_v0, %v727_v10  ;;  %v821_v0 = vpop.f32.mrf.mxu3 }
 0x114   : > { %v872_v24 = vmul.f32 %v2435_v57, %v2435_v57 }
 0x115   : > { %v863_v40 = vmul.f32 %v2378_v31, %v2378_v31  ;;  %v835_v42 = vadd.f32 %v834_v39, %v2378_v31 }
 0x117   : > { %v884_v48 = vadd.f32 %v883_v41, %v863_v40 }
 0x119   : > { %v752_v26 = vpop.f32.mrf.mxu2 }
 0x11a   : > { %v730_v27 = vpop.f32.mrf.mxu0  ;;  %v2441_v61 = vadd.f32 %v2365_v9, %v752_v26 }
 0x11b   : > { %v799_v32 = vpop.f32.mrf.mxu1  ;;  %v2383_v37 = vadd.f32 %v794_v4, %v730_v27  ;;  %v824_v19 = vpop.f32.mrf.mxu3 }
 0x11c   : > { %v2393_v52 = vadd.f32 %v799_v32, %v2343_v47  ;;  %v873_v28 = vmul.f32 %v2441_v61, %v2441_v61 }
 0x11d   : > { %v864_v43 = vmul.f32 %v2383_v37, %v2383_v37  ;;  %v836_v49 = vadd.f32 %v835_v42, %v2383_v37 }
 0x11e   : > { %v866_v47 = vmul.f32 %v2393_v52, %v2393_v52 }
 0x11f   : > { %v885_v56 = vadd.f32 %v884_v48, %v864_v43 }
 0x121   : > { %v755_v44 = vpop.f32.mrf.mxu2 }
 0x122   : > { %v732_v45 = vpop.f32.mrf.mxu0  ;;  %v820_v27 = vadd.f32 %v819_v33, %v755_v44 }
 0x123   : > { %v2395_v53 = vadd.f32 %v796_v13, %v732_v45  ;;  %v801_v55 = vpop.f32.mrf.mxu1  ;;  %v826_v40 = vpop.f32.mrf.mxu3 }
 0x124   : > { %v2401_v63 = vadd.f32 %v801_v55, %v2345_v50  ;;  %v874_v9 = vmul.f32 %v820_v27, %v820_v27 }
 0x125   : > { %v837_v59 = vadd.f32 %v836_v49, %v2395_v53  ;;  %v865_v60 = vmul.f32 %v2395_v53, %v2395_v53 }
 0x126   : > { %v867_v50 = vmul.f32 %v2401_v63, %v2401_v63 }
 0x127   : > { %v886_v4 = vadd.f32 %v885_v56, %v865_v60  ;;  %v838_v5 = vadd.f32 %v837_v59, %v2393_v52 }
 0x129   : > { %v839_v7 = vadd.f32 %v838_v5, %v2401_v63  ;;  %v887_v10 = vadd.f32 %v886_v4, %v866_v47  ;;  %v757_v11 = vpop.f32.mrf.mxu2 }
 0x12a   : > { %v822_v29 = vadd.f32 %v821_v0, %v757_v11 }
 0x12b   : > { %v840_v12 = vadd.f32 %v839_v7, %v2405_v3  ;;  %v888_v13 = vadd.f32 %v887_v10, %v867_v50 }
 0x12c   : > { %v875_v38 = vmul.f32 %v822_v29, %v822_v29 }
 0x12d   : > { %v841_v14 = vadd.f32 %v840_v12, %v2412_v6  ;;  %v889_v15 = vadd.f32 %v888_v13, %v868_v46 }
 0x12f   : > { %v842_v62 = vadd.f32 %v841_v14, %v2421_v54  ;;  %v890_v18 = vadd.f32 %v889_v15, %v869_v51 }
 0x131   : > { %v891_v2 = vadd.f32 %v890_v18, %v870_v16  ;;  %v843_v22 = vadd.f32 %v842_v62, %v2428_v58  ;;  %v760_v23 = vpop.f32.mrf.mxu2 }
 0x132   : > { %v825_v35 = vadd.f32 %v824_v19, %v760_v23  ;;  %v2453_v19 = vld [vmem:[%s2339_s13] sm:$0xff] }
 0x133   : > { %v844_v1 = vadd.f32 %v843_v22, %v2435_v57  ;;  %v892_v8 = vadd.f32 %v891_v2, %v871_v20  ;;  %v995_v2 = vlaneseq  ;;  %v2459_v23 = vperm.slane %v2453_v19, 0 }
 0x134   : > { %v876_v44 = vmul.f32 %v825_v35, %v825_v35 }
 0x135   : > { %v845_v30 = vadd.f32 %v844_v1, %v2441_v61  ;;  %v893_v32 = vadd.f32 %v892_v8, %v872_v24  ;;  %v2462_v24 = vperm.slane %v2453_v19, 5  ;;  %v920_v1 = vld [vmem:[%s445_s23] sm:$0x1]  ;;  %v2464_v8 = vshrl.u32 %v995_v2, 7 }
 0x137   : > { %v846_v26 = vadd.f32 %v845_v30, %v820_v27  ;;  %v894_v34 = vadd.f32 %v893_v32, %v873_v28  ;;  %v2470_v28 = vld [vmem:[%s2339_s13 + $0x8] sm:$0xff]  ;;  %v2473_v30 = vld [vmem:[%s2339_s13 + $0x10] sm:$0xff]  ;;  %v2476_v32 = vmul.f32 0.0, %v2459_v23  ;;  %vm998_vm4 = vcmp.ge.s32.totalorder %v2464_v8, 2 }
 0x139   : > { %v847_v36 = vadd.f32 %v846_v26, %v822_v29  ;;  %v895_v39 = vadd.f32 %v894_v34, %v874_v9  ;;  %v762_v41 = vpop.f32.mrf.mxu2  ;;  %v1052_v9 = vmul.f32 0.0, %v2462_v24  ;;  %v922_v34 = vld [vmem:[%s448_s24] sm:$0x1] }
 0x13a   : > { %v827_v33 = vadd.f32 %v826_v40, %v762_v41  ;;  %v2486_v40 = vperm.slane %v2473_v30, 4 }
 0x13b   : > { %v896_v42 = vadd.f32 %v895_v39, %v875_v38  ;;  %v848_v43 = vadd.f32 %v847_v36, %v825_v35  ;;  %v2480_v35 = vadd.s32 8, %v2464_v8  ;;  %v2483_v36 = vperm.slane %v2470_v28, 7 }
 0x13c   : > { %v877_v49 = vmul.f32 %v827_v33, %v827_v33  ;;  %v2489_v41 = vadd.f32 %v1052_v9, %v2476_v32 }
 0x13d   : > { %v897_v45 = vadd.f32 %v896_v42, %v876_v44  ;;  %v849_v48 = vadd.f32 %v848_v43, %v827_v33  ;;  %v2492_v33 = vperm.slane %v2470_v28, 2  ;;  %v2495_v42 = vmul.f32 0.0, %v2483_v36 }
 0x13e   : > { %vm1005_vm5 = vcmp.lt.s32.totalorder %v2480_v35, 9 }
 0x13f   : > { %v850_v55 = vrot.slane %v849_v48, 4  ;;  %v898_v56 = vadd.f32 %v897_v45, %v877_v49  ;;  %v2499_v45 = vmul.f32 0.0, %v2486_v40 }
 0x141   : > { %v851_v59 = vadd.f32 %v850_v55, %v849_v48  ;;  %v899_v60 = vrot.slane %v898_v56, 4  ;;  %v2038_v48 = vmov 0.0  }
 0x142   : > { %v2502_v49 = vrot.slane %v2038_v48, 1 }
 0x143   : > { %v852_v0 = vrot.slane %v851_v59, 2  ;;  %v900_v47 = vadd.f32 %v899_v60, %v898_v56 }
 0x145   : > { %v853_v4 = vadd.f32 %v852_v0, %v851_v59  ;;  %v901_v5 = vrot.slane %v900_v47, 2 }
 0x147   : > { %v854_v7 = vrot.slane %v853_v4, 1  ;;  %v902_v50 = vadd.f32 %v901_v5, %v900_v47 }
 0x149   : > { %v855_v10 = vadd.f32 %v854_v7, %v853_v4  ;;  %v903_v11 = vrot.slane %v902_v50, 1 }
 0x14b   : > { %v904_v46 = vadd.f32 %v903_v11, %v902_v50  ;;  %v905_v12 = vmul.f32 0.020408163, %v855_v10  ;;  %v2520_v50 = vperm.slane %v2453_v19, 1 }
 0x14d   : > { %v906_v13 = vmul.f32 0.020408163, %v904_v46  ;;  %v907_v51 = vmul.f32 %v905_v12, %v905_v12 }
 0x14f   : > { %v908_v14 = vsub.f32 %v906_v13, %v907_v51 }
 0x151   : > { %v909_v15 = vadd.f32 1e-05, %v908_v14 }
 0x153   : > { %2012 = vrsqrt.f32 %v909_v15  ;;  %vm916_vm2 = vweird.f32 %v909_v15 }
 0x159   : > { %v2013_v16 = vpop.eup %2012 }
 0x15a   : > { %v911_v62 = vmul.f32 %v2013_v16, %v909_v15  ;;  %vm917_vm1 = vweird.f32 %v2013_v16 }
 0x15b   : > { %vm918_vm3 = vmor %vm916_vm2, %vm917_vm1 }
 0x15c   : > { %v912_v18 = vmul.f32 %v2013_v16, %v911_v62 }
 0x15e   : > { %v913_v20 = vmul.f32 0.5, %v912_v18 }
 0x160   : > { %v914_v22 = vsub.f32 1.5, %v913_v20 }
 0x162   : > { %v915_v27 = vmul.f32 %v2013_v16, %v914_v22 }
 0x164   : > { %v919_v29 = vsel %vm918_vm3, %v2013_v16, %v915_v27 }
 0x165   : > { %v921_v26 = vmul.f32 %v920_v1, %v919_v29 }
 0x167   : > { %v923_v38 = vmul.f32 %v921_v26, %v905_v12  ;;  %v925_v39 = vperm.slane %v921_v26, 0 }
 0x169   : > { %v924_v43 = vsub.f32 %v922_v34, %v923_v38  ;;  %v930_v44 = vmul.f32 %v925_v39, %v2367_v17  ;;  %v931_v55 = vmul.f32 %v925_v39, %v2369_v21  ;;  %v932_v56 = vmul.f32 %v925_v39, %v2373_v25 }
 0x16a   : > { %v933_v59 = vmul.f32 %v925_v39, %v2378_v31  ;;  %v934_v60 = vmul.f32 %v925_v39, %v2383_v37  ;;  %v935_v17 = vmul.f32 %v925_v39, %v2395_v53  ;;  %v936_v0 = vmul.f32 %v925_v39, %v2393_v52 }
 0x16b   : > { %v937_v47 = vmul.f32 %v925_v39, %v2401_v63  ;;  %v938_v4 = vmul.f32 %v925_v39, %v2405_v3  ;;  %v939_v21 = vmul.f32 %v925_v39, %v2412_v6  ;;  %v940_v25 = vmul.f32 %v925_v39, %v2421_v54 }
 0x16c   : > { %v942_v31 = vmul.f32 %v925_v39, %v2435_v57  ;;  %v949_v5 = vperm.slane %v924_v43, 0  ;;  %v941_v37 = vmul.f32 %v925_v39, %v2428_v58  ;;  %v943_v7 = vmul.f32 %v925_v39, %v2441_v61 }
 0x16d   : > { %v2523_v52 = vperm.slane %v2453_v19, 6 }
 0x16e   : > { %v955_v53 = vadd.f32 %v949_v5, %v930_v44  ;;  %v956_v63 = vadd.f32 %v949_v5, %v931_v55  ;;  %v957_v3 = vadd.f32 %v949_v5, %v932_v56  ;;  %v958_v10 = vadd.f32 %v949_v5, %v933_v59 }
 0x16f   : > { %v959_v6 = vadd.f32 %v949_v5, %v934_v60  ;;  %v960_v11 = vadd.f32 %v949_v5, %v935_v17  ;;  %v961_v54 = vadd.f32 %v949_v5, %v936_v0  ;;  %v962_v46 = vadd.f32 %v949_v5, %v937_v47 }
 0x170   : > { %v963_v57 = vadd.f32 %v949_v5, %v938_v4  ;;  %v964_v12 = vadd.f32 %v949_v5, %v939_v21  ;;  %v965_v13 = vadd.f32 %v949_v5, %v940_v25  ;;  %v966_v58 = vadd.f32 %v949_v5, %v941_v37 }
 0x171   : > { %v967_v51 = vadd.f32 %v949_v5, %v942_v31  ;;  %v968_v61 = vadd.f32 %v949_v5, %v943_v7  ;;  %v977_v14 = vmax.f32 %v955_v53, 0.0  ;;  %v978_v15 = vmax.f32 %v956_v63, 0.0 }
 0x172   : > { %v979_v16 = vmax.f32 %v957_v3, 0.0  ;;  %v980_v62 = vmax.f32 %v958_v10, 0.0  ;;  %v981_v18 = vmax.f32 %v959_v6, 0.0  ;;  %v982_v20 = vmax.f32 %v960_v11, 0.0 }
 0x173   : > { %v983_v2 = vmax.f32 %v961_v54, 0.0  ;;  %v984_v22 = vmax.f32 %v962_v46, 0.0  ;;  %v985_v27 = vmax.f32 %v963_v57, 0.0  ;;  %v986_v1 = vmax.f32 %v964_v12, 0.0 }
 0x174   : > { %v987_v29 = vmax.f32 %v965_v13, 0.0  ;;  %v988_v9 = vmax.f32 %v966_v58, 0.0  ;;  %v989_v26 = vmax.f32 %v967_v51, 0.0  ;;  %v990_v34 = vmax.f32 %v968_v61, 0.0 }
 0x175   : > { %v2527_v38 = vsel %vm998_vm4, %v977_v14, 0.0  ;;  %v2531_v39 = vsel %vm1005_vm5, %v978_v15, 0.0  ;;  %v2535_v43 = vsel %vm998_vm4, %v979_v16, 0.0  ;;  %v2539_v44 = vsel %vm1005_vm5, %v980_v62, 0.0 }
 0x176   : > { %v2543_v55 = vsel %vm998_vm4, %v981_v18, 0.0  ;;  %v2547_v56 = vsel %vm1005_vm5, %v982_v20, 0.0  ;;  %v2551_v59 = vsel %vm998_vm4, %v983_v2, 0.0  ;;  %v2555_v60 = vsel %vm1005_vm5, %v984_v22, 0.0 }
 0x177   : > { %v2559_v17 = vsel %vm998_vm4, %v985_v27, 0.0  ;;  %v2563_v0 = vsel %vm1005_vm5, %v986_v1, 0.0  ;;  %v2567_v47 = vsel %vm998_vm4, %v987_v29, 0.0  ;;  %v2571_v4 = vsel %vm1005_vm5, %v988_v9, 0.0 }
 0x178   : > { %v2575_v21 = vsel %vm998_vm4, %v989_v26, 0.0  ;;  %v2579_v25 = vsel %vm1005_vm5, %v990_v34, 0.0  ;;  %v1039_v31 = vmul.f32 %v2459_v23, %v2527_v38  ;;  %v1040_v5 = vmul.f32 %v2459_v23, %v2535_v43 }
 0x179   : > { %v1041_v37 = vmul.f32 %v2459_v23, %v2543_v55  ;;  %v1042_v7 = vmul.f32 %v2459_v23, %v2551_v59  ;;  %v1043_v8 = vmul.f32 %v2459_v23, %v2559_v17  ;;  %v1053_v35 = vmul.f32 %v2462_v24, %v2527_v38 }
 0x17a   : > { %v1054_v53 = vmul.f32 %v2462_v24, %v2535_v43  ;;  %v1055_v63 = vmul.f32 %v2462_v24, %v2543_v55  ;;  %v1056_v3 = vmul.f32 %v2462_v24, %v2551_v59  ;;  %v1057_v10 = vmul.f32 %v2462_v24, %v2559_v17 }
 0x17b   : > { %v1058_v6 = vmul.f32 %v2462_v24, %v2567_v47  ;;  %v1060_v23 = vadd.f32 %v1053_v35, %v2476_v32  ;;  %v1067_v11 = vmul.f32 %v2492_v33, %v2527_v38  ;;  %v1068_v54 = vmul.f32 %v2492_v33, %v2535_v43 }
 0x17c   : > { %v1061_v46 = vadd.f32 %v1054_v53, %v1039_v31  ;;  %v1062_v57 = vadd.f32 %v1055_v63, %v1040_v5  ;;  %v1063_v12 = vadd.f32 %v1056_v3, %v1041_v37  ;;  %v1064_v13 = vadd.f32 %v1057_v10, %v1042_v7 }
 0x17d   : > { %v1065_v58 = vadd.f32 %v1058_v6, %v1043_v8  ;;  %v1069_v51 = vmul.f32 %v2492_v33, %v2543_v55  ;;  %v1070_v61 = vmul.f32 %v2492_v33, %v2551_v59  ;;  %v1071_v24 = vmul.f32 %v2492_v33, %v2559_v17 }
 0x17e   : > { %v1072_v32 = vmul.f32 %v2492_v33, %v2567_v47  ;;  %v1073_v14 = vmul.f32 %v2492_v33, %v2575_v21  ;;  %v1074_v15 = vadd.f32 %v1067_v11, %v2489_v41  ;;  %v1075_v16 = vadd.f32 %v1068_v54, %v1060_v23 }
 0x17f   : > { %v1076_v62 = vadd.f32 %v1069_v51, %v1061_v46  ;;  %v1077_v18 = vadd.f32 %v1070_v61, %v1062_v57  ;;  %v1078_v20 = vadd.f32 %v1071_v24, %v1063_v12  ;;  %v1082_v2 = vmul.f32 %v2483_v36, %v2535_v43 }
 0x180   : > { %v1079_v22 = vadd.f32 %v1072_v32, %v1064_v13  ;;  %v1080_v27 = vadd.f32 %v1073_v14, %v1065_v58  ;;  %v1083_v1 = vmul.f32 %v2483_v36, %v2543_v55  ;;  %v1084_v29 = vmul.f32 %v2483_v36, %v2551_v59 }
 0x181   : > { %v1085_v33 = vmul.f32 %v2483_v36, %v2559_v17  ;;  %v1086_v41 = vmul.f32 %v2483_v36, %v2567_v47  ;;  %v1087_v9 = vmul.f32 %v2483_v36, %v2575_v21  ;;  %v1089_v26 = vadd.f32 %v1082_v2, %v1074_v15 }
 0x182   : > { %v1090_v34 = vadd.f32 %v1083_v1, %v1075_v16  ;;  %v1091_v31 = vadd.f32 %v1084_v29, %v1076_v62  ;;  %v1095_v5 = vadd.f32 %v2495_v42, %v1080_v27  ;;  %v1097_v37 = vmul.f32 %v2486_v40, %v2543_v55 }
 0x183   : > { %v1092_v7 = vadd.f32 %v1085_v33, %v1077_v18  ;;  %v1093_v8 = vadd.f32 %v1086_v41, %v1078_v20  ;;  %v1094_v35 = vadd.f32 %v1087_v9, %v1079_v22  ;;  %v1098_v53 = vmul.f32 %v2486_v40, %v2551_v59 }
 0x184   : > { %v1099_v63 = vmul.f32 %v2486_v40, %v2559_v17  ;;  %v1100_v36 = vmul.f32 %v2486_v40, %v2567_v47  ;;  %v1101_v3 = vmul.f32 %v2486_v40, %v2575_v21  ;;  %v1104_v10 = vadd.f32 %v1097_v37, %v1089_v26 }
 0x185   : > { %v1105_v42 = vadd.f32 %v1098_v53, %v1090_v34  ;;  %v1109_v6 = vadd.f32 %v2499_v45, %v1094_v35  ;;  %v1110_v23 = vadd.f32 %v2499_v45, %v1095_v5  ;;  %v1140_v11 = vrot.slane %v2527_v38, 1 }
 0x186   : > { %v1106_v54 = vadd.f32 %v1099_v63, %v1091_v31  ;;  %v1107_v46 = vadd.f32 %v1100_v36, %v1092_v7  ;;  %v1108_v57 = vadd.f32 %v1101_v3, %v1093_v8  ;;  %v1141_v12 = vrot.slane %v2531_v39, 1 }
 0x187   : > { %v1143_v13 = vrot.slane %v2535_v43, 1  ;;  %v1144_v58 = vrot.slane %v2539_v44, 1  ;;  %v1146_v51 = vrot.slane %v2543_v55, 1  ;;  %v1147_v40 = vrot.slane %v2547_v56, 1 }
 0x188   : > { %v1142_v61 = vsel %vm1133_vm6, %v1140_v11, %v1141_v12  ;;  %v1149_v24 = vrot.slane %v2551_v59, 1  ;;  %v1150_v45 = vrot.slane %v2555_v60, 1  ;;  %v1152_v32 = vrot.slane %v2559_v17, 1 }
 0x189   : > { %v1145_v14 = vsel %vm1133_vm6, %v1143_v13, %v1144_v58  ;;  %v2656_v15 = vsel %vm1133_vm6, %v1146_v51, %v1147_v40  ;;  %v1153_v16 = vrot.slane %v2563_v0, 1  ;;  %v1155_v62 = vrot.slane %v2567_v47, 1 }
 0x18a   : > { %v2661_v18 = vsel %vm1133_vm6, %v1149_v24, %v1150_v45  ;;  %v1156_v20 = vrot.slane %v2571_v4, 1  ;;  %v1158_v2 = vrot.slane %v2575_v21, 1  ;;  %v1159_v22 = vrot.slane %v2579_v25, 1 }
 0x18b   : > { %v2667_v27 = vsel %vm1133_vm6, %v1152_v32, %v1153_v16  ;;  %v1179_v1 = vmul.f32 %v2520_v50, %v2502_v49  ;;  %v1181_v29 = vmul.f32 %v2520_v50, %v1142_v61  ;;  %v1182_v33 = vmul.f32 %v2520_v50, %v1145_v14 }
 0x18c   : > { %v1157_v41 = vsel %vm1133_vm6, %v1155_v62, %v1156_v20  ;;  %v1160_v9 = vsel %vm1133_vm6, %v1158_v2, %v1159_v22  ;;  %v1183_v26 = vmul.f32 %v2520_v50, %v2656_v15  ;;  %v1184_v34 = vmul.f32 %v2520_v50, %v2661_v18 }
 0x18d   : > { %v1185_v31 = vmul.f32 %v2520_v50, %v2667_v27  ;;  %v1186_v5 = vadd.f32 %v1179_v1, %v1104_v10  ;;  %v1187_v37 = vadd.f32 %v1179_v1, %v1105_v42  ;;  %v1188_v7 = vadd.f32 %v1181_v29, %v1106_v54 }
 0x18e   : > { %v1189_v8 = vadd.f32 %v1182_v33, %v1107_v46  ;;  %v1190_v35 = vadd.f32 %v1183_v26, %v1108_v57  ;;  %v1191_v53 = vadd.f32 %v1184_v34, %v1109_v6  ;;  %v1194_v63 = vmul.f32 %v2523_v52, %v2502_v49 }
 0x18f   : > { %v1192_v36 = vadd.f32 %v1185_v31, %v1110_v23  ;;  %v1195_v3 = vmul.f32 %v2523_v52, %v1142_v61  ;;  %v1196_v11 = vmul.f32 %v2523_v52, %v1145_v14  ;;  %v1197_v12 = vmul.f32 %v2523_v52, %v2656_v15 }
 0x190   : > { %v1198_v50 = vmul.f32 %v2523_v52, %v2661_v18  ;;  %v1199_v10 = vmul.f32 %v2523_v52, %v2667_v27  ;;  %v1200_v42 = vmul.f32 %v2523_v52, %v1157_v41  ;;  %v1201_v6 = vadd.f32 %v1194_v63, %v1186_v5 }
 0x191   : > { %v1202_v54 = vadd.f32 %v1195_v3, %v1187_v37  ;;  %v1203_v46 = vadd.f32 %v1196_v11, %v1188_v7  ;;  %v1204_v57 = vadd.f32 %v1197_v12, %v1189_v8  ;;  %v1208_v23 = vperm.slane %v2470_v28, 3 }
 0x192   : > { %v1205_v13 = vadd.f32 %v1198_v50, %v1190_v35  ;;  %v1206_v58 = vadd.f32 %v1199_v10, %v1191_v53  ;;  %v1207_v51 = vadd.f32 %v1200_v42, %v1192_v36  ;;  %v1223_v40 = vperm.slane %v2473_v30, 0 }
 0x193   : > { %v1209_v24 = vmul.f32 %v1208_v23, %v1142_v61  ;;  %v1210_v45 = vmul.f32 %v1208_v23, %v1145_v14  ;;  %v1211_v32 = vmul.f32 %v1208_v23, %v2656_v15  ;;  %v1212_v16 = vmul.f32 %v1208_v23, %v2661_v18 }
 0x194   : > { %v1213_v62 = vmul.f32 %v1208_v23, %v2667_v27  ;;  %v1214_v52 = vmul.f32 %v1208_v23, %v1157_v41  ;;  %v1215_v20 = vmul.f32 %v1208_v23, %v1160_v9  ;;  %v1224_v2 = vmul.f32 %v1223_v40, %v1145_v14 }
 0x195   : > { %v1216_v22 = vadd.f32 %v1209_v24, %v1201_v6  ;;  %v1217_v1 = vadd.f32 %v1210_v45, %v1202_v54  ;;  %v1218_v29 = vadd.f32 %v1211_v32, %v1203_v46  ;;  %v1219_v33 = vadd.f32 %v1212_v16, %v1204_v57 }
 0x196   : > { %v1220_v26 = vadd.f32 %v1213_v62, %v1205_v13  ;;  %v1221_v34 = vadd.f32 %v1214_v52, %v1206_v58  ;;  %v1222_v31 = vadd.f32 %v1215_v20, %v1207_v51  ;;  %v1225_v5 = vmul.f32 %v1223_v40, %v2656_v15 }
 0x197   : > { %v1226_v61 = vmul.f32 %v1223_v40, %v2661_v18  ;;  %v1227_v37 = vmul.f32 %v1223_v40, %v2667_v27  ;;  %v1228_v7 = vmul.f32 %v1223_v40, %v1157_v41  ;;  %v1229_v8 = vmul.f32 %v1223_v40, %v1160_v9 }
 0x198   : > { %v1230_v35 = vmul.f32 %v1223_v40, %v2502_v49  ;;  %v1231_v53 = vadd.f32 %v1224_v2, %v1216_v22  ;;  %v1232_v63 = vadd.f32 %v1225_v5, %v1217_v1  ;;  %v1238_v14 = vperm.slane %v2473_v30, 5 }
 0x199   : > { %v1233_v36 = vadd.f32 %v1226_v61, %v1218_v29  ;;  %v1234_v3 = vadd.f32 %v1227_v37, %v1219_v33  ;;  %v1235_v11 = vadd.f32 %v1228_v7, %v1220_v26  ;;  %v1236_v12 = vadd.f32 %v1229_v8, %v1221_v34 }
 0x19a   : > { %v1237_v50 = vadd.f32 %v1230_v35, %v1222_v31  ;;  %v1239_v10 = vmul.f32 %v1238_v14, %v2656_v15  ;;  %v1240_v42 = vmul.f32 %v1238_v14, %v2661_v18  ;;  %v1241_v6 = vmul.f32 %v1238_v14, %v2667_v27 }
 0x19b   : > { %v1242_v54 = vmul.f32 %v1238_v14, %v1157_v41  ;;  %v1243_v46 = vmul.f32 %v1238_v14, %v1160_v9  ;;  %v1244_v57 = vmul.f32 %v1238_v14, %v2502_v49  ;;  %v2707_v51 = vrot.slane %v2038_v48, 2 }
 0x19c   : > { %v1246_v23 = vadd.f32 %v1239_v10, %v1231_v53  ;;  %v1247_v13 = vadd.f32 %v1240_v42, %v1232_v63  ;;  %v1248_v58 = vadd.f32 %v1241_v6, %v1233_v36  ;;  %v1260_v15 = vrot.slane %v2527_v38, 2 }
 0x19d   : > { %v1249_v40 = vadd.f32 %v1242_v54, %v1234_v3  ;;  %v1250_v24 = vadd.f32 %v1243_v46, %v1235_v11  ;;  %v1251_v45 = vadd.f32 %v1244_v57, %v1236_v12  ;;  %v1252_v32 = vadd.f32 %v1244_v57, %v1237_v50 }
 0x19e   : > { %v1261_v18 = vrot.slane %v2531_v39, 2  ;;  %v1263_v27 = vrot.slane %v2535_v43, 2  ;;  %v1264_v41 = vrot.slane %v2539_v44, 2  ;;  %v1266_v49 = vrot.slane %v2543_v55, 2 }
 0x19f   : > { %v1267_v9 = vrot.slane %v2547_v56, 2  ;;  %v1269_v16 = vrot.slane %v2551_v59, 2  ;;  %v1270_v62 = vrot.slane %v2555_v60, 2  ;;  %v1272_v2 = vrot.slane %v2559_v17, 2 }
 0x1a0   : > { %v1262_v52 = vsel %vm1253_vm7, %v1260_v15, %v1261_v18  ;;  %v1265_v20 = vsel %vm1253_vm7, %v1263_v27, %v1264_v41  ;;  %v1273_v22 = vrot.slane %v2563_v0, 2  ;;  %v1275_v33 = vrot.slane %v2567_v47, 2 }
 0x1a1   : > { %v2722_v1 = vsel %vm1253_vm7, %v1266_v49, %v1267_v9  ;;  %v2725_v29 = vsel %vm1253_vm7, %v1269_v16, %v1270_v62  ;;  %v1276_v26 = vrot.slane %v2571_v4, 2  ;;  %v1278_v31 = vrot.slane %v2575_v21, 2 }
 0x1a2   : > { %v2730_v34 = vsel %vm1253_vm7, %v1272_v2, %v1273_v22  ;;  %v1279_v5 = vrot.slane %v2579_v25, 2  ;;  %v1298_v61 = vperm.slane %v2453_v19, 2  ;;  %v1313_v7 = vperm.slane %v2453_v19, 7 }
 0x1a3   : > { %v2736_v37 = vsel %vm1253_vm7, %v1275_v33, %v1276_v26  ;;  %v1328_v8 = vperm.slane %v2470_v28, 4  ;;  %v1343_v35 = vperm.slane %v2473_v30, 1 }
 0x1a4   : > { %v1280_v53 = vsel %vm1253_vm7, %v1278_v31, %v1279_v5  ;;  %v1299_v63 = vmul.f32 %v1298_v61, %v2707_v51  ;;  %v1301_v14 = vmul.f32 %v1298_v61, %v1262_v52  ;;  %v1302_v36 = vmul.f32 %v1298_v61, %v1265_v20 }
 0x1a5   : > { %v1303_v3 = vmul.f32 %v1298_v61, %v2722_v1  ;;  %v1304_v11 = vmul.f32 %v1298_v61, %v2725_v29  ;;  %v1305_v12 = vmul.f32 %v1298_v61, %v2730_v34  ;;  %v1314_v50 = vmul.f32 %v1313_v7, %v2707_v51 }
 0x1a6   : > { %v1306_v10 = vadd.f32 %v1299_v63, %v1246_v23  ;;  %v1307_v42 = vadd.f32 %v1299_v63, %v1247_v13  ;;  %v1308_v6 = vadd.f32 %v1301_v14, %v1248_v58  ;;  %v1309_v54 = vadd.f32 %v1302_v36, %v1249_v40 }
 0x1a7   : > { %v1310_v46 = vadd.f32 %v1303_v3, %v1250_v24  ;;  %v1311_v57 = vadd.f32 %v1304_v11, %v1251_v45  ;;  %v1312_v15 = vadd.f32 %v1305_v12, %v1252_v32  ;;  %v1315_v18 = vmul.f32 %v1313_v7, %v1262_v52 }
 0x1a8   : > { %v1316_v27 = vmul.f32 %v1313_v7, %v1265_v20  ;;  %v1317_v41 = vmul.f32 %v1313_v7, %v2722_v1  ;;  %v1318_v49 = vmul.f32 %v1313_v7, %v2725_v29  ;;  %v1319_v9 = vmul.f32 %v1313_v7, %v2730_v34 }
 0x1a9   : > { %v1320_v16 = vmul.f32 %v1313_v7, %v2736_v37  ;;  %v1321_v62 = vadd.f32 %v1314_v50, %v1306_v10  ;;  %v1322_v2 = vadd.f32 %v1315_v18, %v1307_v42  ;;  %v1329_v22 = vmul.f32 %v1328_v8, %v1262_v52 }
 0x1aa   : > { %v1323_v23 = vadd.f32 %v1316_v27, %v1308_v6  ;;  %v1324_v13 = vadd.f32 %v1317_v41, %v1309_v54  ;;  %v1325_v58 = vadd.f32 %v1318_v49, %v1310_v46  ;;  %v1326_v40 = vadd.f32 %v1319_v9, %v1311_v57 }
 0x1ab   : > { %v1327_v24 = vadd.f32 %v1320_v16, %v1312_v15  ;;  %v1330_v45 = vmul.f32 %v1328_v8, %v1265_v20  ;;  %v1331_v32 = vmul.f32 %v1328_v8, %v2722_v1  ;;  %v1332_v33 = vmul.f32 %v1328_v8, %v2725_v29 }
 0x1ac   : > { %v1333_v26 = vmul.f32 %v1328_v8, %v2730_v34  ;;  %v1334_v31 = vmul.f32 %v1328_v8, %v2736_v37  ;;  %v1335_v5 = vmul.f32 %v1328_v8, %v1280_v53  ;;  %v1336_v61 = vadd.f32 %v1329_v22, %v1321_v62 }
 0x1ad   : > { %v1337_v7 = vadd.f32 %v1330_v45, %v1322_v2  ;;  %v1338_v63 = vadd.f32 %v1331_v32, %v1323_v23  ;;  %v1339_v14 = vadd.f32 %v1332_v33, %v1324_v13  ;;  %v1344_v52 = vmul.f32 %v1343_v35, %v1265_v20 }
 0x1ae   : > { %v1340_v36 = vadd.f32 %v1333_v26, %v1325_v58  ;;  %v1341_v3 = vadd.f32 %v1334_v31, %v1326_v40  ;;  %v1342_v11 = vadd.f32 %v1335_v5, %v1327_v24  ;;  %v1345_v12 = vmul.f32 %v1343_v35, %v2722_v1 }
 0x1af   : > { %v1346_v50 = vmul.f32 %v1343_v35, %v2725_v29  ;;  %v1347_v10 = vmul.f32 %v1343_v35, %v2730_v34  ;;  %v1348_v42 = vmul.f32 %v1343_v35, %v2736_v37  ;;  %v1349_v6 = vmul.f32 %v1343_v35, %v1280_v53 }
 0x1b0   : > { %v1350_v54 = vmul.f32 %v1343_v35, %v2707_v51  ;;  %v1351_v8 = vadd.f32 %v1344_v52, %v1336_v61  ;;  %v1352_v46 = vadd.f32 %v1345_v12, %v1337_v7  ;;  %v1358_v57 = vperm.slane %v2473_v30, 6 }
 0x1b1   : > { %v1353_v15 = vadd.f32 %v1346_v50, %v1338_v63  ;;  %v1354_v20 = vadd.f32 %v1347_v10, %v1339_v14  ;;  %v1355_v18 = vadd.f32 %v1348_v42, %v1340_v36  ;;  %v1356_v27 = vadd.f32 %v1349_v6, %v1341_v3 }
 0x1b2   : > { %v1357_v41 = vadd.f32 %v1350_v54, %v1342_v11  ;;  %v1359_v49 = vmul.f32 %v1358_v57, %v2722_v1  ;;  %v1360_v9 = vmul.f32 %v1358_v57, %v2725_v29  ;;  %v1361_v16 = vmul.f32 %v1358_v57, %v2730_v34 }
 0x1b3   : > { %v1362_v62 = vmul.f32 %v1358_v57, %v2736_v37  ;;  %v1363_v2 = vmul.f32 %v1358_v57, %v1280_v53  ;;  %v1364_v35 = vmul.f32 %v1358_v57, %v2707_v51  ;;  %v2767_v58 = vrot.slane %v2038_v48, 3 }
 0x1b4   : > { %v1366_v22 = vadd.f32 %v1359_v49, %v1351_v8  ;;  %v1367_v23 = vadd.f32 %v1360_v9, %v1352_v46  ;;  %v1368_v13 = vadd.f32 %v1361_v16, %v1353_v15  ;;  %v1380_v29 = vrot.slane %v2527_v38, 3 }
 0x1b5   : > { %v1369_v40 = vadd.f32 %v1362_v62, %v1354_v20  ;;  %v1370_v24 = vadd.f32 %v1363_v2, %v1355_v18  ;;  %v1371_v45 = vadd.f32 %v1364_v35, %v1356_v27  ;;  %v1372_v1 = vadd.f32 %v1364_v35, %v1357_v41 }
 0x1b6   : > { %v1381_v34 = vrot.slane %v2531_v39, 3  ;;  %v1383_v37 = vrot.slane %v2535_v43, 3  ;;  %v1384_v53 = vrot.slane %v2539_v44, 3  ;;  %v1386_v51 = vrot.slane %v2543_v55, 3 }
 0x1b7   : > { %v1387_v32 = vrot.slane %v2547_v56, 3  ;;  %v1389_v33 = vrot.slane %v2551_v59, 3  ;;  %v1390_v26 = vrot.slane %v2555_v60, 3  ;;  %v1392_v61 = vrot.slane %v2559_v17, 3 }
 0x1b8   : > { %v1382_v31 = vsel %vm1373_vm8, %v1380_v29, %v1381_v34  ;;  %v1385_v5 = vsel %vm1373_vm8, %v1383_v37, %v1384_v53  ;;  %v1393_v7 = vrot.slane %v2563_v0, 3  ;;  %v1395_v52 = vrot.slane %v2567_v47, 3 }
 0x1b9   : > { %v2782_v63 = vsel %vm1373_vm8, %v1386_v51, %v1387_v32  ;;  %v2785_v14 = vsel %vm1373_vm8, %v1389_v33, %v1390_v26  ;;  %v1396_v36 = vrot.slane %v2571_v4, 3  ;;  %v1398_v11 = vrot.slane %v2575_v21, 3 }
 0x1ba   : > { %v2790_v3 = vsel %vm1373_vm8, %v1392_v61, %v1393_v7  ;;  %v1399_v12 = vrot.slane %v2579_v25, 3  ;;  %v1418_v50 = vperm.slane %v2453_v19, 3  ;;  %v1433_v42 = vperm.slane %v2470_v28, 0 }
 0x1bb   : > { %v2796_v10 = vsel %vm1373_vm8, %v1395_v52, %v1396_v36  ;;  %v1448_v6 = vperm.slane %v2470_v28, 5  ;;  %v1463_v54 = vperm.slane %v2473_v30, 2 }
 0x1bc   : > { %v1400_v8 = vsel %vm1373_vm8, %v1398_v11, %v1399_v12  ;;  %v1419_v46 = vmul.f32 %v1418_v50, %v2767_v58  ;;  %v1421_v57 = vmul.f32 %v1418_v50, %v1382_v31  ;;  %v1422_v15 = vmul.f32 %v1418_v50, %v1385_v5 }
 0x1bd   : > { %v1423_v20 = vmul.f32 %v1418_v50, %v2782_v63  ;;  %v1424_v18 = vmul.f32 %v1418_v50, %v2785_v14  ;;  %v1425_v27 = vmul.f32 %v1418_v50, %v2790_v3  ;;  %v1434_v41 = vmul.f32 %v1433_v42, %v2767_v58 }
 0x1be   : > { %v1426_v49 = vadd.f32 %v1419_v46, %v1366_v22  ;;  %v1427_v9 = vadd.f32 %v1419_v46, %v1367_v23  ;;  %v1428_v16 = vadd.f32 %v1421_v57, %v1368_v13  ;;  %v1429_v62 = vadd.f32 %v1422_v15, %v1369_v40 }
 0x1bf   : > { %v1430_v2 = vadd.f32 %v1423_v20, %v1370_v24  ;;  %v1431_v35 = vadd.f32 %v1424_v18, %v1371_v45  ;;  %v1432_v29 = vadd.f32 %v1425_v27, %v1372_v1  ;;  %v1435_v34 = vmul.f32 %v1433_v42, %v1382_v31 }
 0x1c0   : > { %v1436_v37 = vmul.f32 %v1433_v42, %v1385_v5  ;;  %v1437_v53 = vmul.f32 %v1433_v42, %v2782_v63  ;;  %v1438_v51 = vmul.f32 %v1433_v42, %v2785_v14  ;;  %v1439_v32 = vmul.f32 %v1433_v42, %v2790_v3 }
 0x1c1   : > { %v1440_v33 = vmul.f32 %v1433_v42, %v2796_v10  ;;  %v1441_v26 = vadd.f32 %v1434_v41, %v1426_v49  ;;  %v1442_v61 = vadd.f32 %v1435_v34, %v1427_v9  ;;  %v1449_v7 = vmul.f32 %v1448_v6, %v1382_v31 }
 0x1c2   : > { %v1443_v22 = vadd.f32 %v1436_v37, %v1428_v16  ;;  %v1444_v23 = vadd.f32 %v1437_v53, %v1429_v62  ;;  %v1445_v13 = vadd.f32 %v1438_v51, %v1430_v2  ;;  %v1446_v40 = vadd.f32 %v1439_v32, %v1431_v35 }
 0x1c3   : > { %v1447_v24 = vadd.f32 %v1440_v33, %v1432_v29  ;;  %v1450_v45 = vmul.f32 %v1448_v6, %v1385_v5  ;;  %v1451_v1 = vmul.f32 %v1448_v6, %v2782_v63  ;;  %v1452_v52 = vmul.f32 %v1448_v6, %v2785_v14 }
 0x1c4   : > { %v1453_v36 = vmul.f32 %v1448_v6, %v2790_v3  ;;  %v1454_v11 = vmul.f32 %v1448_v6, %v2796_v10  ;;  %v1455_v12 = vmul.f32 %v1448_v6, %v1400_v8  ;;  %v1456_v50 = vadd.f32 %v1449_v7, %v1441_v26 }
 0x1c5   : > { %v1457_v42 = vadd.f32 %v1450_v45, %v1442_v61  ;;  %v1458_v46 = vadd.f32 %v1451_v1, %v1443_v22  ;;  %v1459_v57 = vadd.f32 %v1452_v52, %v1444_v23  ;;  %v1464_v31 = vmul.f32 %v1463_v54, %v1385_v5 }
 0x1c6   : > { %v1460_v15 = vadd.f32 %v1453_v36, %v1445_v13  ;;  %v1461_v20 = vadd.f32 %v1454_v11, %v1446_v40  ;;  %v1462_v18 = vadd.f32 %v1455_v12, %v1447_v24  ;;  %v1465_v27 = vmul.f32 %v1463_v54, %v2782_v63 }
 0x1c7   : > { %v1466_v41 = vmul.f32 %v1463_v54, %v2785_v14  ;;  %v1467_v49 = vmul.f32 %v1463_v54, %v2790_v3  ;;  %v1468_v9 = vmul.f32 %v1463_v54, %v2796_v10  ;;  %v1469_v16 = vmul.f32 %v1463_v54, %v1400_v8 }
 0x1c8   : > { %v1470_v62 = vmul.f32 %v1463_v54, %v2767_v58  ;;  %v1471_v6 = vadd.f32 %v1464_v31, %v1456_v50  ;;  %v1472_v2 = vadd.f32 %v1465_v27, %v1457_v42  ;;  %v1478_v35 = vperm.slane %v2473_v30, 7 }
 0x1c9   : > { %v1473_v29 = vadd.f32 %v1466_v41, %v1458_v46  ;;  %v1474_v5 = vadd.f32 %v1467_v49, %v1459_v57  ;;  %v1475_v34 = vadd.f32 %v1468_v9, %v1460_v15  ;;  %v1476_v37 = vadd.f32 %v1469_v16, %v1461_v20 }
 0x1ca   : > { %v1477_v53 = vadd.f32 %v1470_v62, %v1462_v18  ;;  %v1479_v51 = vmul.f32 %v1478_v35, %v2782_v63  ;;  %v1480_v32 = vmul.f32 %v1478_v35, %v2785_v14  ;;  %v1481_v33 = vmul.f32 %v1478_v35, %v2790_v3 }
 0x1cb   : > { %v1482_v26 = vmul.f32 %v1478_v35, %v2796_v10  ;;  %v1483_v61 = vmul.f32 %v1478_v35, %v1400_v8  ;;  %v1484_v54 = vmul.f32 %v1478_v35, %v2767_v58  ;;  %v2827_v13 = vrot.slane %v2038_v48, 4 }
 0x1cc   : > { %v1486_v7 = vadd.f32 %v1479_v51, %v1471_v6  ;;  %v1487_v22 = vadd.f32 %v1480_v32, %v1472_v2  ;;  %v1488_v23 = vadd.f32 %v1481_v33, %v1473_v29  ;;  %v1500_v14 = vrot.slane %v2527_v38, 4 }
 0x1cd   : > { %v1489_v40 = vadd.f32 %v1482_v26, %v1474_v5  ;;  %v1490_v24 = vadd.f32 %v1483_v61, %v1475_v34  ;;  %v1491_v45 = vadd.f32 %v1484_v54, %v1476_v37  ;;  %v1492_v63 = vadd.f32 %v1484_v54, %v1477_v53 }
 0x1ce   : > { %v1501_v3 = vrot.slane %v2531_v39, 4  ;;  %v1503_v10 = vrot.slane %v2535_v43, 4  ;;  %v1504_v8 = vrot.slane %v2539_v44, 4  ;;  %v1506_v58 = vrot.slane %v2543_v55, 4 }
 0x1cf   : > { %v1507_v1 = vrot.slane %v2547_v56, 4  ;;  %v1509_v52 = vrot.slane %v2551_v59, 4  ;;  %v1510_v48 = vrot.slane %v2555_v60, 4  ;;  %v1512_v38 = vrot.slane %v2559_v17, 4 }
 0x1d0   : > { %v1502_v36 = vsel %vm1493_vm9, %v1500_v14, %v1501_v3  ;;  %v1505_v11 = vsel %vm1493_vm9, %v1503_v10, %v1504_v8  ;;  %v1513_v39 = vrot.slane %v2563_v0, 4  ;;  %v1515_v55 = vrot.slane %v2567_v47, 4 }
 0x1d1   : > { %v2842_v43 = vsel %vm1493_vm9, %v1506_v58, %v1507_v1  ;;  %v2845_v44 = vsel %vm1493_vm9, %v1509_v52, %v1510_v48  ;;  %v1516_v56 = vrot.slane %v2571_v4, 4  ;;  %v1518_v60 = vrot.slane %v2575_v21, 4 }
 0x1d2   : > { %v2850_v59 = vsel %vm1493_vm9, %v1512_v38, %v1513_v39  ;;  %v1519_v12 = vrot.slane %v2579_v25, 4  ;;  %v1538_v17 = vperm.slane %v2453_v19, 4  ;;  %v1553_v50 = vperm.slane %v2470_v28, 1 }
 0x1d3   : > { %v2856_v0 = vsel %vm1493_vm9, %v1515_v55, %v1516_v56  ;;  %v1568_v42 = vperm.slane %v2470_v28, 6  ;;  %v1583_v47 = vperm.slane %v2473_v30, 3 }
 0x1d4   : > { %v1520_v4 = vsel %vm1493_vm9, %v1518_v60, %v1519_v12  ;;  %v1539_v46 = vmul.f32 %v1538_v17, %v2827_v13  ;;  %v1541_v57 = vmul.f32 %v1538_v17, %v1502_v36  ;;  %v1542_v31 = vmul.f32 %v1538_v17, %v1505_v11 }
 0x1d5   : > { %v1543_v21 = vmul.f32 %v1538_v17, %v2842_v43  ;;  %v1544_v25 = vmul.f32 %v1538_v17, %v2845_v44  ;;  %v1545_v19 = vmul.f32 %v1538_v17, %v2850_v59  ;;  %v1554_v15 = vmul.f32 %v1553_v50, %v2827_v13 }
 0x1d6   : > { %v1546_v20 = vadd.f32 %v1539_v46, %v1486_v7  ;;  %v1547_v18 = vadd.f32 %v1539_v46, %v1487_v22  ;;  %v1548_v27 = vadd.f32 %v1541_v57, %v1488_v23  ;;  %v1549_v28 = vadd.f32 %v1542_v31, %v1489_v40 }
 0x1d7   : > { %v1550_v41 = vadd.f32 %v1543_v21, %v1490_v24  ;;  %v1551_v30 = vadd.f32 %v1544_v25, %v1491_v45  ;;  %v1552_v49 = vadd.f32 %v1545_v19, %v1492_v63  ;;  %v1555_v9 = vmul.f32 %v1553_v50, %v1502_v36  ;;  %v2011_v24 = vld [vmem:[%s2339_s13 + $0x18] ss:$0 sm:$0xff] }
 0x1d8   : > { %v1556_v16 = vmul.f32 %v1553_v50, %v1505_v11  ;;  %v1557_v62 = vmul.f32 %v1553_v50, %v2842_v43  ;;  %v1558_v6 = vmul.f32 %v1553_v50, %v2845_v44  ;;  %v1559_v2 = vmul.f32 %v1553_v50, %v2850_v59 }
 0x1d9   : > { %v1560_v35 = vmul.f32 %v1553_v50, %v2856_v0  ;;  %v1561_v29 = vadd.f32 %v1554_v15, %v1546_v20  ;;  %v1562_v5 = vadd.f32 %v1555_v9, %v1547_v18  ;;  %v1569_v34 = vmul.f32 %v1568_v42, %v1502_v36 }
 0x1da   : > { %v1563_v37 = vadd.f32 %v1556_v16, %v1548_v27  ;;  %v1564_v53 = vadd.f32 %v1557_v62, %v1549_v28  ;;  %v1565_v51 = vadd.f32 %v1558_v6, %v1550_v41  ;;  %v1566_v32 = vadd.f32 %v1559_v2, %v1551_v30 }
 0x1db   : > { %v1567_v33 = vadd.f32 %v1560_v35, %v1552_v49  ;;  %v1570_v26 = vmul.f32 %v1568_v42, %v1505_v11  ;;  %v1571_v61 = vmul.f32 %v1568_v42, %v2842_v43  ;;  %v1572_v54 = vmul.f32 %v1568_v42, %v2845_v44 }
 0x1dc   : > { %v1573_v7 = vmul.f32 %v1568_v42, %v2850_v59  ;;  %v1574_v22 = vmul.f32 %v1568_v42, %v2856_v0  ;;  %v1575_v23 = vmul.f32 %v1568_v42, %v1520_v4  ;;  %v1576_v40 = vadd.f32 %v1569_v34, %v1561_v29 }
 0x1dd   : > { %v1577_v45 = vadd.f32 %v1570_v26, %v1562_v5  ;;  %v1578_v63 = vadd.f32 %v1571_v61, %v1563_v37  ;;  %v1579_v14 = vadd.f32 %v1572_v54, %v1564_v53  ;;  %v1584_v3 = vmul.f32 %v1583_v47, %v1505_v11 }
 0x1de   : > { %v1580_v10 = vadd.f32 %v1573_v7, %v1565_v51  ;;  %v1581_v8 = vadd.f32 %v1574_v22, %v1566_v32  ;;  %v1582_v58 = vadd.f32 %v1575_v23, %v1567_v33  ;;  %v1585_v1 = vmul.f32 %v1583_v47, %v2842_v43 }
 0x1df   : > { %v1586_v52 = vmul.f32 %v1583_v47, %v2845_v44  ;;  %v1587_v48 = vmul.f32 %v1583_v47, %v2850_v59  ;;  %v1588_v36 = vmul.f32 %v1583_v47, %v2856_v0  ;;  %v1589_v38 = vmul.f32 %v1583_v47, %v1520_v4 }
 0x1e0   : > { %v1590_v39 = vmul.f32 %v1583_v47, %v2827_v13  ;;  %v1591_v55 = vadd.f32 %v1584_v3, %v1576_v40  ;;  %v1592_v56 = vadd.f32 %v1585_v1, %v1577_v45  ;;  %v1599_v60 = vmul.f32 %v2011_v24, %v2842_v43 }
 0x1e1   : > { %v1593_v11 = vadd.f32 %v1586_v52, %v1578_v63  ;;  %v1594_v12 = vadd.f32 %v1587_v48, %v1579_v14  ;;  %v1595_v17 = vadd.f32 %v1588_v36, %v1580_v10  ;;  %v1596_v50 = vadd.f32 %v1589_v38, %v1581_v8 }
 0x1e2   : > { %v1600_v42 = vmul.f32 %v2011_v24, %v2845_v44  ;;  %v1601_v46 = vmul.f32 %v2011_v24, %v2850_v59  ;;  %v1602_v57 = vmul.f32 %v2011_v24, %v2856_v0  ;;  %v1597_v31 = vadd.f32 %v1590_v39, %v1582_v58 }
 0x1e3   : > { %v1603_v21 = vmul.f32 %v2011_v24, %v1520_v4  ;;  %v1604_v25 = vmul.f32 %v2011_v24, %v2827_v13  ;;  %v1606_v19 = vadd.f32 %v1599_v60, %v1591_v55 }
 0x1e4   : > { %v1607_v47 = vadd.f32 %v1600_v42, %v1592_v56  ;;  %v1608_v15 = vadd.f32 %v1601_v46, %v1593_v11  ;;  %v1609_v20 = vadd.f32 %v1602_v57, %v1594_v12 }
 0x1e5   : > { %v1610_v18 = vadd.f32 %v1603_v21, %v1595_v17  ;;  %1613 = vst [vmem:[%s442_s17] sm:$0xff] %v1606_v19  ;;  %v1611_v43 = vadd.f32 %v1604_v25, %v1596_v50  ;;  %v1612_v27 = vadd.f32 %v1604_v25, %v1597_v31 }
 0x1e6   : > { %1614 = vst [vmem:[%s442_s17 + $0x8] sm:$0xff] %v1607_v47 }
 0x1e7   : > { %1615 = vst [vmem:[%s442_s17 + $0x10] sm:$0xff] %v1608_v15  ;;  %1626 = sbr.rel (!%p2104_p5) target bundleno = 500 (0x1f4), region = 123 }
 0x1e8   : > { %1616 = vst [vmem:[%s442_s17 + $0x18] sm:$0xff] %v1609_v20 }
 0x1e9   : > { %1617 = vst [vmem:[%s442_s17 + $0x20] sm:$0xff] %v1610_v18 }
 0x1ea   : > { %1618 = vst [vmem:[%s442_s17 + $0x28] sm:$0xff] %v1611_v43 }
 0x1eb   : > { %1619 = vst [vmem:[%s442_s17 + $0x30] sm:$0xff] %v1612_v27 }
 0x1ec   : > { %v1669_v13 = vld [vmem:[%s442_s17] sm:$0xff] }
 0x1ed   : > { %v1671_v44 = vld [vmem:[%s442_s17 + $0x8] sm:$0xff]  ;;  %1670 = vst [vmem:[%s1628_s6] sm:$0xff] %v1669_v13 }
 0x1ee   : > { %v1673_v59 = vld [vmem:[%s442_s17 + $0x10] sm:$0xff]  ;;  %1672 = vst [vmem:[%s1628_s6 + $0x48] sm:$0xff] %v1671_v44 }
 0x1ef   : > { %v1675_v0 = vld [vmem:[%s442_s17 + $0x18] sm:$0xff]  ;;  %1674 = vst [vmem:[%s1628_s6 + $0x90] sm:$0xff] %v1673_v59 }
 0x1f0   : > { %v1677_v4 = vld [vmem:[%s442_s17 + $0x20] sm:$0xff]  ;;  %1676 = vst [vmem:[%s1628_s6 + $0xd8] sm:$0xff] %v1675_v0 }
 0x1f1   : > { %v1679_v28 = vld [vmem:[%s442_s17 + $0x28] sm:$0xff]  ;;  %1678 = vst [vmem:[%s1628_s6 + $0x120] sm:$0xff] %v1677_v4 }
 0x1f2   : > { %v1681_v41 = vld [vmem:[%s442_s17 + $0x30] sm:$0xff]  ;;  %1680 = vst [vmem:[%s1628_s6 + $0x168] sm:$0xff] %v1679_v28 }
 0x1f3   : > { %1682 = vst [vmem:[%s1628_s6 + $0x1b0] sm:$0xff] %v1681_v41 }
 0x1f4 PF: > { %p12_p11 = scmp.ge.s32.totalorder %s2088_s22, 11   ;;  %s2911_s18 = smov %s2032_s19 }
 0x1f5   : > { %s2912_s19 = smov %s2098_s25  ;;  %s2913_s20 = smov %s2088_s22 }
 0x1f6   :  { %14 = sbr.rel (!%p12_p11) target bundleno = 2 (0x2), region = 206 }

</bundles_post_ra>
